<compile_context>
chip_gen: v7x
topology: tpu7x:2x2x1
jax: 0.10.0
libtpu: 0.0.40
codegen_flags: <defaults>
</compile_context>

<pallas_src>
import functools

import jax
import jax.numpy as jnp
from jax.experimental import pallas as pl
from jax.experimental.pallas import tpu as pltpu


_CPAD = 128  # lane-dense padded feature / head width


def _vmem_budget_bytes():
    # Per-generation scoped-VMEM budget: ~3/4 of physical capacity
    # (128 MiB on v5e/v6e -> 96 MiB; 64 MiB on v7x -> 48 MiB), capped.
    try:
        cap = int(pltpu.get_tpu_info().vmem_capacity_bytes)
    except Exception:  # fall back to the most restrictive generation (v7x)
        cap = 64 * 1024 * 1024
    return min((cap * 3) // 4, 100 * 1024 * 1024)


# ----------------------------------------------------------------------------
# Fused kernel: conv stem + bias + ReLU + GAP + fc(1024) + ReLU + 3 heads
#               + sigmoid / masked softmaxes, one lane-dense store per sample.
# ----------------------------------------------------------------------------
def _conv_gap_head_kernel(x_ref, w_ref, b_ref, pool_ref,
                          wfc_ref, bfc_ref, whd_ref, bhd_ref,
                          o_ref, acc_ref, *,
                          th, inv_hw, n_char, n_diag, n_area):
    """One row-tile of one sample per grid step.

    x_ref    : [H+2, (W+2)*Cin] f32   padded sample; block index depends only on
                                      the sample axis, so it stays resident in
                                      VMEM across row tiles.
    w_ref    : [3, (W+2)*Cin, W*Cout] bf16 banded conv weights (one band per dy).
    b_ref    : [1, W*Cout] f32        conv bias tiled across w.
    pool_ref : [W*Cout, CPAD] f32     width-pool + channel-pad matrix.
    wfc_ref  : [CPAD, 1024] bf16      base_model.fc weights (channel-padded).
    bfc_ref  : [1, 1024] f32
    whd_ref  : [1024, CPAD] bf16      three task heads fused + zero-padded.
    bhd_ref  : [1, CPAD] f32
    o_ref    : [1, CPAD] f32          final per-sample outputs (cols >= 17 are 0).
    acc_ref  : [1, W*Cout] f32        running GAP row-sum of relu(conv).
    """
    t = pl.program_id(1)

    @pl.when(t == 0)
    def _init():
        acc_ref[...] = jnp.zeros_like(acc_ref)

    h0 = pl.multiple_of(t * th, th)

    # 3x3 conv as three accumulating lane-dense bf16 matmuls (one per dy tap
    # row); dx taps and input channels are folded into the contraction by the
    # banded weights.  Slice the f32 ref, cast the loaded tile to bf16.
    def _tap(dy):
        lhs = x_ref[pl.ds(h0 + dy, th), :].astype(jnp.bfloat16)   # [th,(W+2)*Cin]
        return jnp.dot(lhs, w_ref[dy], preferred_element_type=jnp.float32)

    psum = _tap(0)                 # init from first tap: no zeros + add
    psum = psum + _tap(1)
    psum = psum + _tap(2)

    conv = jnp.maximum(psum + b_ref[...], 0.0)               # bias + ReLU
    acc_ref[...] += jnp.sum(conv, axis=0, keepdims=True)     # running row-sum

    @pl.when(t == pl.num_programs(1) - 1)
    def _finalize():
        # Global average pool: sum over w (and scatter channel k into lane k of
        # CPAD) with one tiny matmul, then normalize by H*W.
        pooled = jnp.dot(acc_ref[...], pool_ref[...],
                         preferred_element_type=jnp.float32) * inv_hw   # [1,CPAD]

        # base_model.fc : Linear(num_features -> 1024), then ReLU.
        h1 = jnp.dot(pooled.astype(jnp.bfloat16), wfc_ref[...],
                     preferred_element_type=jnp.float32)
        h1 = jnp.maximum(h1 + bfc_ref[...], 0.0)                        # [1,1024]

        # Three task heads fused into one lane-dense zero-padded matmul.
        logits = jnp.dot(h1.astype(jnp.bfloat16), whd_ref[...],
                         preferred_element_type=jnp.float32) + bhd_ref[...]

        col = jax.lax.broadcasted_iota(jnp.int32, logits.shape, 1)
        c0 = n_char
        c1 = n_char + n_diag
        c2 = n_char + n_diag + n_area

        def _masked_softmax(mask):
            m = jnp.max(jnp.where(mask, logits, -1e30), axis=-1, keepdims=True)
            e = jnp.where(mask, jnp.exp(logits - m), 0.0)
            s = jnp.sum(e, axis=-1, keepdims=True)
            r = pl.reciprocal(s, approx=True)     # EUP slot (essentially free)
            r = r * (2.0 - s * r)                 # one Newton step -> ~f32 accurate
            return e * r

        out = jnp.where(col < c0, jax.nn.sigmoid(logits), 0.0)      # characteristics
        out = out + _masked_softmax((col >= c0) & (col < c1))       # diagnosis
        out = out + _masked_softmax((col >= c1) & (col < c2))       # area
        o_ref[...] = out   # one unmasked lane-dense store; cols >= c2 are exactly 0


# ----------------------------------------------------------------------------
# Wrapper
# ----------------------------------------------------------------------------
def cnn_forward(x_nchw, params, *, row_tile=None, head_sizes=(7, 6, 4)):
    n, cin, h, w = x_nchw.shape
    w_conv = params["w_conv"]                     # [3, 3, Cin, Cout]
    cout = w_conv.shape[-1]
    wcout = w * cout                              # flattened (w, cout) lane width

    if row_tile is None:
        row_tile = h if h <= 128 else 128         # fill the MXU M-dim
    # TODO(synk): add a remainder tile for H not divisible by the row tile.
    assert h % row_tile == 0, "H must be a multiple of the row tile"

    # ---- layout plumbing (wrapper side, cheap): NCHW -> padded NHWC, flatten (w,cin)
    x_nhwc = jnp.transpose(x_nchw, (0, 2, 3, 1)).astype(jnp.float32)
    xp = jnp.pad(x_nhwc, ((0, 0), (1, 1), (1, 1), (0, 0)))        # 'same' 3x3 padding
    x_flat = xp.reshape(n, h + 2, (w + 2) * cin)                  # [N, H+2, (W+2)*Cin]

    # Banded weight per kernel row dy:
    #   bigw[dy][(w+dx)*Cin + c, w*Cout + k] = w_conv[dy, dx, c, k]
    # Weight-only transform, so the kernel streams the raw image (no im2col).
    def _band(dy):
        return sum(jnp.kron(jnp.eye(w + 2, w, k=-dx, dtype=jnp.float32),
                            w_conv[dy, dx].astype(jnp.float32))
                   for dx in range(3))
    bigw = jnp.stack([_band(dy) for dy in range(3)]).astype(jnp.bfloat16)
    b_flat = jnp.tile(params["b_conv"].astype(jnp.float32), (w,)).reshape(1, wcout)
    # width-pool + channel-pad matrix: sums over w, puts channel k into lane k of CPAD
    pool = jnp.kron(jnp.ones((w, 1), jnp.float32),
                    jnp.eye(cout, _CPAD, dtype=jnp.float32))      # [W*Cout, CPAD]

    feat_dim = params["w_fc"].shape[-1]
    n_heads = params["w_heads"].shape[-1]
    wfc_pad = jnp.pad(params["w_fc"], ((0, _CPAD - cout), (0, 0))).astype(jnp.bfloat16)
    bfc = params["b_fc"].reshape(1, -1).astype(jnp.float32)
    whd_pad = jnp.pad(params["w_heads"],
                      ((0, 0), (0, _CPAD - n_heads))).astype(jnp.bfloat16)
    bhd_pad = jnp.pad(params["b_heads"],
                      (0, _CPAD - n_heads)).reshape(1, _CPAD).astype(jnp.float32)

    grid = (n, h // row_tile)
    cost = pl.CostEstimate(
        flops=(2 * n * h * ((w + 2) * cin) * wcout * 3            # banded conv (as executed)
               + 2 * n * wcout * _CPAD                            # width-pool matmul
               + 2 * n * (_CPAD * feat_dim + feat_dim * _CPAD)),  # fc + fused heads
        transcendentals=3 * n * _CPAD,
        bytes_accessed=(x_flat.size * 4 + bigw.size * 2 + b_flat.size * 4
                        + pool.size * 4 + wfc_pad.size * 2 + bfc.size * 4
                        + whd_pad.size * 2 + bhd_pad.size * 4 + n * _CPAD * 4),
    )

    _inv = lambda nb, t: (0, 0)   # grid-invariant weight blocks
    out3 = pl.pallas_call(
        functools.partial(_conv_gap_head_kernel, th=row_tile, inv_hw=1.0 / (h * w),
                          n_char=head_sizes[0], n_diag=head_sizes[1],
                          n_area=head_sizes[2]),
        out_shape=jax.ShapeDtypeStruct((n, 1, _CPAD), jnp.float32),
        grid=grid,
        in_specs=[
            # full padded sample, resident in VMEM across the row-tile axis
            pl.BlockSpec((None, h + 2, (w + 2) * cin), lambda nb, t: (nb, 0, 0)),
            pl.BlockSpec((3, (w + 2) * cin, wcout), lambda nb, t: (0, 0, 0)),
            pl.BlockSpec((1, wcout), _inv),
            pl.BlockSpec((wcout, _CPAD), _inv),
            pl.BlockSpec((_CPAD, feat_dim), _inv),
            pl.BlockSpec((1, feat_dim), _inv),
            pl.BlockSpec((feat_dim, _CPAD), _inv),
            pl.BlockSpec((1, _CPAD), _inv),
        ],
        out_specs=pl.BlockSpec((None, 1, _CPAD), lambda nb, t: (nb, 0, 0)),
        scratch_shapes=[pltpu.VMEM((1, wcout), jnp.float32)],
        compiler_params=pltpu.CompilerParams(
            dimension_semantics=("parallel", "arbitrary"),
            vmem_limit_bytes=_vmem_budget_bytes()),
        cost_estimate=cost,
    )(x_flat, bigw, b_flat, pool, wfc_pad, bfc, whd_pad, bhd_pad)

    # torch.cat((char, diag, area), dim=1)  ->  first 17 (lane-padded) columns
    return out3.reshape(n, _CPAD)[:, :n_heads]


# ----------------------------------------------------------------------------
# Pure-JAX reference (for validation) and parameter init
# ----------------------------------------------------------------------------
def cnn_reference(x_nchw, params, head_sizes=(7, 6, 4)):
    n, cin, h, w = x_nchw.shape
    x = jnp.transpose(x_nchw, (0, 2, 3, 1)).astype(jnp.float32)
    xp = jnp.pad(x, ((0, 0), (1, 1), (1, 1), (0, 0)))
    conv = jnp.zeros((n, h, w, params["w_conv"].shape[-1]), jnp.float32)
    for dy in range(3):
        for dx in range(3):
            conv = conv + jnp.einsum("nhwc,ck->nhwk",
                                     xp[:, dy:dy + h, dx:dx + w, :],
                                     params["w_conv"][dy, dx])
    conv = jnp.maximum(conv + params["b_conv"], 0.0)
    pooled = conv.mean(axis=(1, 2))
    h1 = jnp.maximum(pooled @ params["w_fc"] + params["b_fc"], 0.0)
    logits = h1 @ params["w_heads"] + params["b_heads"]
    c0 = head_sizes[0]
    c1 = head_sizes[0] + head_sizes[1]
    return jnp.concatenate([
        jax.nn.sigmoid(logits[:, :c0]),
        jax.nn.softmax(logits[:, c0:c1], axis=-1),
        jax.nn.softmax(logits[:, c1:], axis=-1)], axis=1)


def init_params(key, c_in=4, c_stem=8, feat_dim=1024,
                n_characteristics=7, n_diagnosis=6, n_area=4):
    ks = jax.random.split(key, 10)
    scale = 0.1
    w_conv = scale * jax.random.normal(ks[0], (3, 3, c_in, c_stem), jnp.float32)
    b_conv = scale * jax.random.normal(ks[1], (c_stem,), jnp.float32)
    w_fc = scale * jax.random.normal(ks[2], (c_stem, feat_dim), jnp.float32)
    b_fc = scale * jax.random.normal(ks[3], (feat_dim,), jnp.float32)
    w_char = scale * jax.random.normal(ks[4], (feat_dim, n_characteristics), jnp.float32)
    b_char = scale * jax.random.normal(ks[5], (n_characteristics,), jnp.float32)
    w_diag = scale * jax.random.normal(ks[6], (feat_dim, n_diagnosis), jnp.float32)
    b_diag = scale * jax.random.normal(ks[7], (n_diagnosis,), jnp.float32)
    w_area = scale * jax.random.normal(ks[8], (feat_dim, n_area), jnp.float32)
    b_area = scale * jax.random.normal(ks[9], (n_area,), jnp.float32)
    return {
        "w_conv": w_conv,
        "b_conv": b_conv,
        "w_fc": w_fc,
        "b_fc": b_fc,
        "w_heads": jnp.concatenate([w_char, w_diag, w_area], axis=1),  # [1024, 17]
        "b_heads": jnp.concatenate([b_char, b_diag, b_area], axis=0),  # [17]
    }


if __name__ == "__main__":
    key = jax.random.PRNGKey(0)
    k_x, k_p = jax.random.split(key)

    # small NCHW input consistent with an image-CNN forward
    x = jax.random.normal(k_x, (2, 4, 16, 16), jnp.float32)
    params = init_params(k_p)

    out = jax.jit(cnn_forward)(x, params)
    out = jax.block_until_ready(out)

    assert out.shape == (2, 17), out.shape
    # sanity: the two softmax segments each sum to 1
    assert jnp.allclose(jnp.sum(out[:, 7:13], axis=-1), 1.0, atol=1e-4)
    assert jnp.allclose(jnp.sum(out[:, 13:17], axis=-1), 1.0, atol=1e-4)
    # cross-check against a pure-JAX f32 reference (bf16 MXU inputs -> loose tol)
    ref = cnn_reference(x, params)
    assert jnp.allclose(out, ref, atol=3e-2), float(jnp.max(jnp.abs(out - ref)))

    print("KERNEL_OK")
</pallas_src>

<mosaic_0001>
module attributes {stable_mosaic.version = 11 : i64} {
  func.func @_conv_gap_head_kernel(%arg0: i32, %arg1: i32, %arg2: memref<1x18x72xf32, #tpu.memory_space<vmem>>, %arg3: memref<3x72x128xbf16, #tpu.memory_space<vmem>>, %arg4: memref<1x128xf32, #tpu.memory_space<vmem>>, %arg5: memref<128x128xf32, #tpu.memory_space<vmem>>, %arg6: memref<128x1024xbf16, #tpu.memory_space<vmem>>, %arg7: memref<1x1024xf32, #tpu.memory_space<vmem>>, %arg8: memref<1024x128xbf16, #tpu.memory_space<vmem>>, %arg9: memref<1x128xf32, #tpu.memory_space<vmem>>, %arg10: memref<1x1x128xf32, #tpu.memory_space<vmem>>, %arg11: memref<1x128xf32, #tpu.memory_space<vmem>>) attributes {dimension_semantics = [#tpu.dimension_semantics<parallel>, #tpu.dimension_semantics<arbitrary>], iteration_bounds = array<i64: 2, 1>, scalar_prefetch = 0 : i64, scratch_operands = 1 : i64, tpu.core_type = #tpu.core_type<tc>, window_params = [{transform_indices = @transform_0, window_bounds = array<i64: 1, 18, 72>}, {pipeline_mode = #tpu.pipeline_mode<synchronous>, transform_indices = @transform_1, window_bounds = array<i64: 3, 72, 128>}, {pipeline_mode = #tpu.pipeline_mode<synchronous>, transform_indices = @transform_2, window_bounds = array<i64: 1, 128>}, {pipeline_mode = #tpu.pipeline_mode<synchronous>, transform_indices = @transform_3, window_bounds = array<i64: 128, 128>}, {pipeline_mode = #tpu.pipeline_mode<synchronous>, transform_indices = @transform_4, window_bounds = array<i64: 128, 1024>}, {pipeline_mode = #tpu.pipeline_mode<synchronous>, transform_indices = @transform_5, window_bounds = array<i64: 1, 1024>}, {pipeline_mode = #tpu.pipeline_mode<synchronous>, transform_indices = @transform_6, window_bounds = array<i64: 1024, 128>}, {pipeline_mode = #tpu.pipeline_mode<synchronous>, transform_indices = @transform_7, window_bounds = array<i64: 1, 128>}, {transform_indices = @transform_8, window_bounds = array<i64: 1, 1, 128>}]} {
    %c0_i32 = arith.constant 0 : i32
    %0 = arith.cmpi eq, %arg1, %c0_i32 : i32
    %1 = arith.extui %0 : i1 to i32
    %c0_i32_0 = arith.constant 0 : i32
    %2 = arith.cmpi ne, %1, %c0_i32_0 : i32
    scf.if %2 {
      %cst_26 = arith.constant 0.000000e+00 : f32
      %44 = vector.broadcast %cst_26 : f32 to vector<1x128xf32>
      %c0_27 = arith.constant 0 : index
      %c0_28 = arith.constant 0 : index
      %45 = vector.load %arg11[%c0_27, %c0_28] : memref<1x128xf32, #tpu.memory_space<vmem>>, vector<1x128xf32>
      tpu.vector_store %arg11[%c0_27, %c0_28], %44 {strides = array<i32>} : memref<1x128xf32, #tpu.memory_space<vmem>>, vector<1x128xf32>,
    } else {
    }
    %c16_i32 = arith.constant 16 : i32
    %3 = arith.muli %arg1, %c16_i32 : i32
    %4 = tpu.assume_multiple %3, 16 : i32
    %c0_i32_1 = arith.constant 0 : i32
    %5 = arith.addi %4, %c0_i32_1 : i32
    %c0 = arith.constant 0 : index
    %6 = arith.index_cast %5 : i32 to index
    %c0_2 = arith.constant 0 : index
    %7 = vector.load %arg2[%c0, %6, %c0_2] : memref<1x18x72xf32, #tpu.memory_space<vmem>>, vector<1x16x72xf32>
    %8 = vector.shape_cast %7 : vector<1x16x72xf32> to vector<16x72xf32>
    %9 = arith.truncf %8 : vector<16x72xf32> to vector<16x72xbf16>
    %c0_3 = arith.constant 0 : index
    %c0_4 = arith.constant 0 : index
    %c0_5 = arith.constant 0 : index
    %10 = vector.load %arg3[%c0_3, %c0_4, %c0_5] : memref<3x72x128xbf16, #tpu.memory_space<vmem>>, vector<1x72x128xbf16>
    %11 = vector.shape_cast %10 : vector<1x72x128xbf16> to vector<72x128xbf16>
    %cst = arith.constant dense<0.000000e+00> : vector<16x128xf32>
    %12 = tpu.matmul %9, %11, %cst {dimension_numbers = #tpu.dot_dimension_numbers<[1], [0], [0], [1], [0, 0, 1, 1], [], []>} : vector<16x72xbf16>, vector<72x128xbf16>, vector<16x128xf32> -> vector<16x128xf32>
    %c1_i32 = arith.constant 1 : i32
    %13 = arith.addi %4, %c1_i32 : i32
    %c0_6 = arith.constant 0 : index
    %14 = arith.index_cast %13 : i32 to index
    %c0_7 = arith.constant 0 : index
    %15 = vector.load %arg2[%c0_6, %14, %c0_7] : memref<1x18x72xf32, #tpu.memory_space<vmem>>, vector<1x16x72xf32>
    %16 = vector.shape_cast %15 : vector<1x16x72xf32> to vector<16x72xf32>
    %17 = arith.truncf %16 : vector<16x72xf32> to vector<16x72xbf16>
    %c1 = arith.constant 1 : index
    %c0_8 = arith.constant 0 : index
    %c0_9 = arith.constant 0 : index
    %18 = vector.load %arg3[%c1, %c0_8, %c0_9] : memref<3x72x128xbf16, #tpu.memory_space<vmem>>, vector<1x72x128xbf16>
    %19 = vector.shape_cast %18 : vector<1x72x128xbf16> to vector<72x128xbf16>
    %cst_10 = arith.constant dense<0.000000e+00> : vector<16x128xf32>
    %20 = tpu.matmul %17, %19, %cst_10 {dimension_numbers = #tpu.dot_dimension_numbers<[1], [0], [0], [1], [0, 0, 1, 1], [], []>} : vector<16x72xbf16>, vector<72x128xbf16>, vector<16x128xf32> -> vector<16x128xf32>
    %21 = arith.addf %12, %20 : vector<16x128xf32>
    %c2_i32 = arith.constant 2 : i32
    %22 = arith.addi %4, %c2_i32 : i32
    %c0_11 = arith.constant 0 : index
    %23 = arith.index_cast %22 : i32 to index
    %c0_12 = arith.constant 0 : index
    %24 = vector.load %arg2[%c0_11, %23, %c0_12] : memref<1x18x72xf32, #tpu.memory_space<vmem>>, vector<1x16x72xf32>
    %25 = vector.shape_cast %24 : vector<1x16x72xf32> to vector<16x72xf32>
    %26 = arith.truncf %25 : vector<16x72xf32> to vector<16x72xbf16>
    %c2 = arith.constant 2 : index
    %c0_13 = arith.constant 0 : index
    %c0_14 = arith.constant 0 : index
    %27 = vector.load %arg3[%c2, %c0_13, %c0_14] : memref<3x72x128xbf16, #tpu.memory_space<vmem>>, vector<1x72x128xbf16>
    %28 = vector.shape_cast %27 : vector<1x72x128xbf16> to vector<72x128xbf16>
    %cst_15 = arith.constant dense<0.000000e+00> : vector<16x128xf32>
    %29 = tpu.matmul %26, %28, %cst_15 {dimension_numbers = #tpu.dot_dimension_numbers<[1], [0], [0], [1], [0, 0, 1, 1], [], []>} : vector<16x72xbf16>, vector<72x128xbf16>, vector<16x128xf32> -> vector<16x128xf32>
    %30 = arith.addf %21, %29 : vector<16x128xf32>
    %c0_16 = arith.constant 0 : index
    %c0_17 = arith.constant 0 : index
    %31 = vector.load %arg4[%c0_16, %c0_17] : memref<1x128xf32, #tpu.memory_space<vmem>>, vector<1x128xf32>
    %32 = vector.broadcast %31 : vector<1x128xf32> to vector<16x128xf32>
    %33 = arith.addf %30, %32 : vector<16x128xf32>
    %cst_18 = arith.constant 0.000000e+00 : f32
    %34 = vector.broadcast %cst_18 : f32 to vector<16x128xf32>
    %35 = arith.maximumf %33, %34 : vector<16x128xf32>
    %c0_19 = arith.constant 0 : index
    %c0_20 = arith.constant 0 : index
    %36 = vector.load %arg11[%c0_19, %c0_20] : memref<1x128xf32, #tpu.memory_space<vmem>>, vector<1x128xf32>
    %cst_21 = arith.constant dense<0.000000e+00> : vector<128xf32>
    %37 = vector.multi_reduction <add>, %35, %cst_21 [0] : vector<16x128xf32> to vector<128xf32>
    %38 = vector.shape_cast %37 : vector<128xf32> to vector<1x128xf32>
    %39 = arith.addf %36, %38 : vector<1x128xf32>
    %c0_22 = arith.constant 0 : index
    %c0_23 = arith.constant 0 : index
    %40 = vector.load %arg11[%c0_22, %c0_23] : memref<1x128xf32, #tpu.memory_space<vmem>>, vector<1x128xf32>
    tpu.vector_store %arg11[%c0_22, %c0_23], %39 {strides = array<i32>} : memref<1x128xf32, #tpu.memory_space<vmem>>, vector<1x128xf32>,
    %c0_i32_24 = arith.constant 0 : i32
    %41 = arith.cmpi eq, %arg1, %c0_i32_24 : i32
    %42 = arith.extui %41 : i1 to i32
    %c0_i32_25 = arith.constant 0 : i32
    %43 = arith.cmpi ne, %42, %c0_i32_25 : i32
    scf.if %43 {
      %c0_26 = arith.constant 0 : index
      %c0_27 = arith.constant 0 : index
      %44 = vector.load %arg11[%c0_26, %c0_27] : memref<1x128xf32, #tpu.memory_space<vmem>>, vector<1x128xf32>
      %c0_28 = arith.constant 0 : index
      %c0_29 = arith.constant 0 : index
      %45 = vector.load %arg5[%c0_28, %c0_29] : memref<128x128xf32, #tpu.memory_space<vmem>>, vector<128x128xf32>
      %cst_30 = arith.constant dense<0.000000e+00> : vector<1x128xf32>
      %46 = tpu.matmul %44, %45, %cst_30 {dimension_numbers = #tpu.dot_dimension_numbers<[1], [0], [0], [1], [0, 0, 1, 1], [], []>} : vector<1x128xf32>, vector<128x128xf32>, vector<1x128xf32> -> vector<1x128xf32>
      %cst_31 = arith.constant 3.906250e-03 : f32
      %47 = vector.broadcast %cst_31 : f32 to vector<1x128xf32>
      %48 = arith.mulf %46, %47 : vector<1x128xf32>
      %49 = arith.truncf %48 : vector<1x128xf32> to vector<1x128xbf16>
      %c0_32 = arith.constant 0 : index
      %c0_33 = arith.constant 0 : index
      %50 = vector.load %arg6[%c0_32, %c0_33] : memref<128x1024xbf16, #tpu.memory_space<vmem>>, vector<128x1024xbf16>
      %cst_34 = arith.constant dense<0.000000e+00> : vector<1x1024xf32>
      %51 = tpu.matmul %49, %50, %cst_34 {dimension_numbers = #tpu.dot_dimension_numbers<[1], [0], [0], [1], [0, 0, 1, 1], [], []>} : vector<1x128xbf16>, vector<128x1024xbf16>, vector<1x1024xf32> -> vector<1x1024xf32>
      %c0_35 = arith.constant 0 : index
      %c0_36 = arith.constant 0 : index
      %52 = vector.load %arg7[%c0_35, %c0_36] : memref<1x1024xf32, #tpu.memory_space<vmem>>, vector<1x1024xf32>
      %53 = arith.addf %51, %52 : vector<1x1024xf32>
      %cst_37 = arith.constant 0.000000e+00 : f32
      %54 = vector.broadcast %cst_37 : f32 to vector<1x1024xf32>
      %55 = arith.maximumf %53, %54 : vector<1x1024xf32>
      %56 = arith.truncf %55 : vector<1x1024xf32> to vector<1x1024xbf16>
      %c0_38 = arith.constant 0 : index
      %c0_39 = arith.constant 0 : index
      %57 = vector.load %arg8[%c0_38, %c0_39] : memref<1024x128xbf16, #tpu.memory_space<vmem>>, vector<1024x128xbf16>
      %cst_40 = arith.constant dense<0.000000e+00> : vector<1x128xf32>
      %58 = tpu.matmul %56, %57, %cst_40 {dimension_numbers = #tpu.dot_dimension_numbers<[1], [0], [0], [1], [0, 0, 1, 1], [], []>} : vector<1x1024xbf16>, vector<1024x128xbf16>, vector<1x128xf32> -> vector<1x128xf32>
      %c0_41 = arith.constant 0 : index
      %c0_42 = arith.constant 0 : index
      %59 = vector.load %arg9[%c0_41, %c0_42] : memref<1x128xf32, #tpu.memory_space<vmem>>, vector<1x128xf32>
      %60 = arith.addf %58, %59 : vector<1x128xf32>
      %61 = tpu.iota {dimensions = array<i32: 1>} : vector<1x128xi32>
      %c7_i32 = arith.constant 7 : i32
      %62 = vector.broadcast %c7_i32 : i32 to vector<1x128xi32>
      %63 = arith.cmpi slt, %61, %62 : vector<1x128xi32>
      %64 = arith.negf %60 : vector<1x128xf32>
      %65 = math.exp %64 : vector<1x128xf32>
      %cst_43 = arith.constant 1.000000e+00 : f32
      %66 = vector.broadcast %cst_43 : f32 to vector<1x128xf32>
      %67 = arith.addf %66, %65 : vector<1x128xf32>
      %68 = arith.divf %66, %67 : vector<1x128xf32>
      %cst_44 = arith.constant 0.000000e+00 : f32
      %69 = vector.broadcast %cst_44 : f32 to vector<1x128xf32>
      %70 = arith.select %63, %68, %69 : vector<1x128xi1>, vector<1x128xf32>
      %c7_i32_45 = arith.constant 7 : i32
      %71 = vector.broadcast %c7_i32_45 : i32 to vector<1x128xi32>
      %72 = arith.cmpi sge, %61, %71 : vector<1x128xi32>
      %c13_i32 = arith.constant 13 : i32
      %73 = vector.broadcast %c13_i32 : i32 to vector<1x128xi32>
      %74 = arith.cmpi slt, %61, %73 : vector<1x128xi32>
      %75 = arith.andi %72, %74 : vector<1x128xi1>
      %cst_46 = arith.constant -1.000000e+30 : f32
      %76 = vector.broadcast %cst_46 : f32 to vector<1x128xf32>
      %77 = arith.select %75, %60, %76 : vector<1x128xi1>, vector<1x128xf32>
      %cst_47 = arith.constant dense<0xFF800000> : vector<1xf32>
      %78 = vector.multi_reduction <maximumf>, %77, %cst_47 [1] : vector<1x128xf32> to vector<1xf32>
      %79 = vector.shape_cast %78 : vector<1xf32> to vector<1x1xf32>
      %80 = vector.broadcast %79 : vector<1x1xf32> to vector<1x128xf32>
      %81 = arith.subf %60, %80 : vector<1x128xf32>
      %82 = math.exp %81 : vector<1x128xf32>
      %cst_48 = arith.constant 0.000000e+00 : f32
      %83 = vector.broadcast %cst_48 : f32 to vector<1x128xf32>
      %84 = arith.select %75, %82, %83 : vector<1x128xi1>, vector<1x128xf32>
      %cst_49 = arith.constant dense<0.000000e+00> : vector<1xf32>
      %85 = vector.multi_reduction <add>, %84, %cst_49 [1] : vector<1x128xf32> to vector<1xf32>
      %86 = vector.shape_cast %85 : vector<1xf32> to vector<1x1xf32>
      %87 = tpu.reciprocal %86 {approx = true} : vector<1x1xf32> -> vector<1x1xf32>
      %88 = arith.mulf %86, %87 : vector<1x1xf32>
      %cst_50 = arith.constant 2.000000e+00 : f32
      %89 = vector.broadcast %cst_50 : f32 to vector<1x1xf32>
      %90 = arith.subf %89, %88 : vector<1x1xf32>
      %91 = arith.mulf %87, %90 : vector<1x1xf32>
      %92 = vector.broadcast %91 : vector<1x1xf32> to vector<1x128xf32>
      %93 = arith.mulf %84, %92 : vector<1x128xf32>
      %94 = arith.addf %70, %93 : vector<1x128xf32>
      %c13_i32_51 = arith.constant 13 : i32
      %95 = vector.broadcast %c13_i32_51 : i32 to vector<1x128xi32>
      %96 = arith.cmpi sge, %61, %95 : vector<1x128xi32>
      %c17_i32 = arith.constant 17 : i32
      %97 = vector.broadcast %c17_i32 : i32 to vector<1x128xi32>
      %98 = arith.cmpi slt, %61, %97 : vector<1x128xi32>
      %99 = arith.andi %96, %98 : vector<1x128xi1>
      %cst_52 = arith.constant -1.000000e+30 : f32
      %100 = vector.broadcast %cst_52 : f32 to vector<1x128xf32>
      %101 = arith.select %99, %60, %100 : vector<1x128xi1>, vector<1x128xf32>
      %cst_53 = arith.constant dense<0xFF800000> : vector<1xf32>
      %102 = vector.multi_reduction <maximumf>, %101, %cst_53 [1] : vector<1x128xf32> to vector<1xf32>
      %103 = vector.shape_cast %102 : vector<1xf32> to vector<1x1xf32>
      %104 = vector.broadcast %103 : vector<1x1xf32> to vector<1x128xf32>
      %105 = arith.subf %60, %104 : vector<1x128xf32>
      %106 = math.exp %105 : vector<1x128xf32>
      %cst_54 = arith.constant 0.000000e+00 : f32
      %107 = vector.broadcast %cst_54 : f32 to vector<1x128xf32>
      %108 = arith.select %99, %106, %107 : vector<1x128xi1>, vector<1x128xf32>
      %cst_55 = arith.constant dense<0.000000e+00> : vector<1xf32>
      %109 = vector.multi_reduction <add>, %108, %cst_55 [1] : vector<1x128xf32> to vector<1xf32>
      %110 = vector.shape_cast %109 : vector<1xf32> to vector<1x1xf32>
      %111 = tpu.reciprocal %110 {approx = true} : vector<1x1xf32> -> vector<1x1xf32>
      %112 = arith.mulf %110, %111 : vector<1x1xf32>
      %cst_56 = arith.constant 2.000000e+00 : f32
      %113 = vector.broadcast %cst_56 : f32 to vector<1x1xf32>
      %114 = arith.subf %113, %112 : vector<1x1xf32>
      %115 = arith.mulf %111, %114 : vector<1x1xf32>
      %116 = vector.broadcast %115 : vector<1x1xf32> to vector<1x128xf32>
      %117 = arith.mulf %108, %116 : vector<1x128xf32>
      %118 = arith.addf %94, %117 : vector<1x128xf32>
      %c0_57 = arith.constant 0 : index
      %c0_58 = arith.constant 0 : index
      %c0_59 = arith.constant 0 : index
      %119 = vector.load %arg10[%c0_57, %c0_58, %c0_59] : memref<1x1x128xf32, #tpu.memory_space<vmem>>, vector<1x1x128xf32>
      %120 = vector.shape_cast %119 : vector<1x1x128xf32> to vector<1x128xf32>
      %121 = vector.shape_cast %118 : vector<1x128xf32> to vector<1x1x128xf32>
      tpu.vector_store %arg10[%c0_57, %c0_58, %c0_59], %121 {strides = array<i32>} : memref<1x1x128xf32, #tpu.memory_space<vmem>>, vector<1x1x128xf32>,
    } else {
    }
    return
  }
  func.func @transform_0(%arg0: i32, %arg1: i32) -> (i32, i32, i32) {
    %c0_i32 = arith.constant 0 : i32
    %c0_i32_0 = arith.constant 0 : i32
    %c0_i32_1 = arith.constant 0 : i32
    return %arg0, %c0_i32, %c0_i32_0 : i32, i32, i32
  }
  func.func @transform_1(%arg0: i32, %arg1: i32) -> (i32, i32, i32) {
    %c0_i32 = arith.constant 0 : i32
    %c0_i32_0 = arith.constant 0 : i32
    %c0_i32_1 = arith.constant 0 : i32
    %c0_i32_2 = arith.constant 0 : i32
    return %c0_i32, %c0_i32_0, %c0_i32_1 : i32, i32, i32
  }
  func.func @transform_2(%arg0: i32, %arg1: i32) -> (i32, i32) {
    %c0_i32 = arith.constant 0 : i32
    %c0_i32_0 = arith.constant 0 : i32
    %c0_i32_1 = arith.constant 0 : i32
    return %c0_i32, %c0_i32_0 : i32, i32
  }
  func.func @transform_3(%arg0: i32, %arg1: i32) -> (i32, i32) {
    %c0_i32 = arith.constant 0 : i32
    %c0_i32_0 = arith.constant 0 : i32
    %c0_i32_1 = arith.constant 0 : i32
    return %c0_i32, %c0_i32_0 : i32, i32
  }
  func.func @transform_4(%arg0: i32, %arg1: i32) -> (i32, i32) {
    %c0_i32 = arith.constant 0 : i32
    %c0_i32_0 = arith.constant 0 : i32
    %c0_i32_1 = arith.constant 0 : i32
    return %c0_i32, %c0_i32_0 : i32, i32
  }
  func.func @transform_5(%arg0: i32, %arg1: i32) -> (i32, i32) {
    %c0_i32 = arith.constant 0 : i32
    %c0_i32_0 = arith.constant 0 : i32
    %c0_i32_1 = arith.constant 0 : i32
    return %c0_i32, %c0_i32_0 : i32, i32
  }
  func.func @transform_6(%arg0: i32, %arg1: i32) -> (i32, i32) {
    %c0_i32 = arith.constant 0 : i32
    %c0_i32_0 = arith.constant 0 : i32
    %c0_i32_1 = arith.constant 0 : i32
    return %c0_i32, %c0_i32_0 : i32, i32
  }
  func.func @transform_7(%arg0: i32, %arg1: i32) -> (i32, i32) {
    %c0_i32 = arith.constant 0 : i32
    %c0_i32_0 = arith.constant 0 : i32
    %c0_i32_1 = arith.constant 0 : i32
    return %c0_i32, %c0_i32_0 : i32, i32
  }
  func.func @transform_8(%arg0: i32, %arg1: i32) -> (i32, i32, i32) {
    %c0_i32 = arith.constant 0 : i32
    %c0_i32_0 = arith.constant 0 : i32
    %c0_i32_1 = arith.constant 0 : i32
    return %arg0, %c0_i32, %c0_i32_0 : i32, i32, i32
  }
}

</mosaic_0001>

<bundles_post_ra>
// kernel: tile.8
= control target key start
LH: loop header
LB: loop body
LE: loop exit
PB: predicated region body
PF: predicated region fallthrough
CT: control target
= control target key end

     0   :  { %s28_s0 = inlined_call_operand.vmem [shape: f32[8], index: 0, kind: input, shape index: {}]   ;;  %s29_s1 = inlined_call_operand.vmem [shape: f32[16,8], index: 1, kind: output, shape index: {}]  }
   0x1   :  { %v4_v0 = vld [vmem:[%s28_s0] ss:$0 sm:$0xff] }
   0x2   :  { %5 = vst [vmem:[%s29_s1] sm:$0xff] %v4_v0  ;;  %8 = vst [vmem:[%s29_s1 + $0x8] sm:$0xff] %v4_v0 }

// kernel: tile.9
= control target key start
LH: loop header
LB: loop body
LE: loop exit
PB: predicated region body
PF: predicated region fallthrough
CT: control target
= control target key end

     0   :  { %s131_s10 = smov 120   ;;  %s132_s11 = smov 104   ;;  %vm3_vm0 = vcmask 64512   ;;  %vm9_vm1 = vcmask 1048512   ;;  %vm15_vm2 = vcmask 982912   ;;  %vm21_vm3 = vcmask 917312   ;;  %s207_s0 = inlined_call_operand.vmem [shape: f32[16,8], index: 0, kind: input, shape index: {}]   ;;  %s208_s1 = inlined_call_operand.vmem [shape: f32[1,128], index: 1, kind: output, shape index: {}]  }
   0x1   :  { %v101_v0 = vld [vmem:[%s207_s0 + $0xf] sm:$0x1]   ;;  %v103_v1 = vld [vmem:[%s207_s0 + $0xd] sm:$0x1]   ;;  %v102_v2 = vld [vmem:[%s207_s0 + $0xe] sm:$0x1]  }
   0x2   :  { %7 = vrot.lane.b32.xlu0 %v101_v0, %s131_s10  ;;  %19 = vrot.lane.b32.xlu1 %v103_v1, %s132_s11  ;;  %v104_v3 = vld [vmem:[%s207_s0 + $0xc] sm:$0x1]   ;;  %s133_s16 = smov 112   ;;  %s134_s17 = smov 96   ;;  %v105_v4 = vld [vmem:[%s207_s0 + $0xb] sm:$0x1]  }
   0x3   :  { %v106_v5 = vld [vmem:[%s207_s0 + $0xa] sm:$0x1]   ;;  %v2_v6 = vld [vmem:[%s207_s0] sm:$0x1]   ;;  %s135_s24 = smov 88   ;;  %s136_s25 = smov 80  }
   0x4   :  { %4 = vst.msk [vmem:[#allocation0] sm:$0x1] %vm3_vm0, %v2_v6   ;;  %v107_v7 = vld [vmem:[%s207_s0 + $0x9] sm:$0x1]   ;;  %v108_v8 = vld [vmem:[%s207_s0 + $0x8] sm:$0x1]  }
   0x5   :  { %s137_s30 = smov 72   ;;  %s138_s2 = smov 64   ;;  %v109_v9 = vld [vmem:[%s207_s0 + $0x7] sm:$0x1]   ;;  %v110_v10 = vld [vmem:[%s207_s0 + $0x6] sm:$0x1]  }
   0x6   :  { %13 = vrot.lane.b32.xlu0 %v102_v2, %s133_s16  ;;  %25 = vrot.lane.b32.xlu1 %v104_v3, %s134_s17  ;;  %s139_s7 = smov 56   ;;  %s140_s8 = smov 48   ;;  %v111_v11 = vld [vmem:[%s207_s0 + $0x5] sm:$0x1]   ;;  %v112_v12 = vld [vmem:[%s207_s0 + $0x4] sm:$0x1]  }
   0x7   :  { %s141_s13 = smov 40   ;;  %s142_s14 = smov 32   ;;  %v113_v13 = vld [vmem:[%s207_s0 + $0x3] sm:$0x1]   ;;  %v114_v14 = vld [vmem:[%s207_s0 + $0x2] sm:$0x1]  }
   0x8   :  { %s143_s19 = smov 24   ;;  %s144_s20 = smov 16   ;;  %v115_v15 = vld [vmem:[%s207_s0 + $0x1] sm:$0x1]   ;;  %vm27_vm4 = vcmask 851712   ;;  %vm33_vm5 = vcmask 786112  }
   0x9   :  { %s145_s0 = smov 8   ;;  %vm39_vm6 = vcmask 720512   ;;  %vm45_vm7 = vcmask 654912   ;;  %vm51_vm8 = vcmask 589312   ;;  %vm57_vm9 = vcmask 523712  }
   0xa   :  { %31 = vrot.lane.b32.xlu0 %v105_v4, %s135_s24  ;;  %37 = vrot.lane.b32.xlu1 %v106_v5, %s136_s25  ;;  %vm63_vm10 = vcmask 458112   ;;  %vm69_vm11 = vcmask 392512   ;;  %vm75_vm12 = vcmask 326912   ;;  %vm81_vm13 = vcmask 261312  }
   0xb   :  { %vm87_vm14 = vcmask 195712   ;;  %vm93_vm15 = vcmask 130112  }
   0xe   :  { %43 = vrot.lane.b32.xlu0 %v107_v7, %s137_s30  ;;  %49 = vrot.lane.b32.xlu1 %v108_v8, %s138_s2 }
  0x12   :  { %55 = vrot.lane.b32.xlu0 %v109_v9, %s139_s7  ;;  %61 = vrot.lane.b32.xlu1 %v110_v10, %s140_s8 }
  0x16   :  { %67 = vrot.lane.b32.xlu0 %v111_v11, %s141_s13  ;;  %73 = vrot.lane.b32.xlu1 %v112_v12, %s142_s14 }
  0x1a   :  { %79 = vrot.lane.b32.xlu0 %v113_v13, %s143_s19  ;;  %85 = vrot.lane.b32.xlu1 %v114_v14, %s144_s20 }
  0x1e   :  { %91 = vrot.lane.b32.xlu0 %v115_v15, %s145_s0 }
  0x74   :  { %v8_v16 = vpop.permute.xlu0 %7   ;;  %v20_v17 = vpop.permute.xlu1 %19  }
  0x75   :  { %10 = vst.msk [vmem:[#allocation0] sm:$0x1] %vm9_vm1, %v8_v16  }
  0x78   :  { %v14_v18 = vpop.permute.xlu0 %13   ;;  %v26_v19 = vpop.permute.xlu1 %25  }
  0x79   :  { %16 = vst.msk [vmem:[#allocation0] sm:$0x1] %vm15_vm2, %v14_v18  }
  0x7a   :  { %22 = vst.msk [vmem:[#allocation0] sm:$0x1] %vm21_vm3, %v20_v17  }
  0x7b   :  { %28 = vst.msk [vmem:[#allocation0] sm:$0x1] %vm27_vm4, %v26_v19  }
  0x7c   :  { %v32_v20 = vpop.permute.xlu0 %31   ;;  %v38_v21 = vpop.permute.xlu1 %37  }
  0x7d   :  { %34 = vst.msk [vmem:[#allocation0] sm:$0x1] %vm33_vm5, %v32_v20  }
  0x7e   :  { %40 = vst.msk [vmem:[#allocation0] sm:$0x1] %vm39_vm6, %v38_v21  }
  0x80   :  { %v44_v22 = vpop.permute.xlu0 %43   ;;  %v50_v23 = vpop.permute.xlu1 %49  }
  0x81   :  { %46 = vst.msk [vmem:[#allocation0] sm:$0x1] %vm45_vm7, %v44_v22  }
  0x82   :  { %52 = vst.msk [vmem:[#allocation0] sm:$0x1] %vm51_vm8, %v50_v23  }
  0x84   :  { %v56_v24 = vpop.permute.xlu0 %55   ;;  %v62_v25 = vpop.permute.xlu1 %61  }
  0x85   :  { %58 = vst.msk [vmem:[#allocation0] sm:$0x1] %vm57_vm9, %v56_v24  }
  0x86   :  { %64 = vst.msk [vmem:[#allocation0] sm:$0x1] %vm63_vm10, %v62_v25  }
  0x88   :  { %v68_v26 = vpop.permute.xlu0 %67   ;;  %v74_v27 = vpop.permute.xlu1 %73  }
  0x89   :  { %70 = vst.msk [vmem:[#allocation0] sm:$0x1] %vm69_vm11, %v68_v26  }
  0x8a   :  { %76 = vst.msk [vmem:[#allocation0] sm:$0x1] %vm75_vm12, %v74_v27  }
  0x8c   :  { %v80_v28 = vpop.permute.xlu0 %79   ;;  %v86_v29 = vpop.permute.xlu1 %85  }
  0x8d   :  { %82 = vst.msk [vmem:[#allocation0] sm:$0x1] %vm81_vm13, %v80_v28  }
  0x8e   :  { %88 = vst.msk [vmem:[#allocation0] sm:$0x1] %vm87_vm14, %v86_v29  }
  0x90   :  { %v92_v30 = vpop.permute.xlu0 %91  }
  0x91   :  { %94 = vst.msk [vmem:[#allocation0] sm:$0x1] %vm93_vm15, %v92_v30  }
  0x98   :  { %v98_v31 = vld [vmem:[#allocation0] sm:$0x1] }
  0x99   :  { %100 = vst [vmem:[%s208_s1] sm:$0x1] %v98_v31 }

// kernel: cnn_forward.1
= control target key start
LH: loop header
LB: loop body
LE: loop exit
PB: predicated region body
PF: predicated region fallthrough
CT: control target
= control target key end

     0   :  { %13 = vsyncpa [#allocation4], 0  ;;  %s3502_s0 = inlined_call_operand.vmem [shape: f32[2,18,72], index: 0, kind: input, shape index: {}]   ;;  %s3503_s1 = inlined_call_operand.vmem [shape: bf16[3,72,128], index: 1, kind: input, shape index: {}]   ;;  %s3504_s2 = inlined_call_operand.vmem [shape: f32[1,128], index: 2, kind: input, shape index: {}]   ;;  %s3505_s3 = inlined_call_operand.vmem [shape: f32[128,128], index: 3, kind: input, shape index: {}]   ;;  %s3506_s4 = inlined_call_operand.vmem [shape: bf16[128,1024], index: 4, kind: input, shape index: {}]   ;;  %s3507_s5 = inlined_call_operand.vmem [shape: f32[1,1024], index: 5, kind: input, shape index: {}]   ;;  %s3508_s6 = inlined_call_operand.vmem [shape: bf16[1024,128], index: 6, kind: input, shape index: {}]   ;;  %s3509_s7 = inlined_call_operand.vmem [shape: f32[1,128], index: 7, kind: input, shape index: {}]   ;;  %s3510_s8 = inlined_call_operand.hbm [shape: f32[2,1,128], index: 8, kind: output, shape index: {}]  }
   0x1   :  { %15 = vsyncpa [#allocation4 + $0x1], 0  ;;  %s2803_s27 = smov 0   ;;  %s2805_s28 = smov 0  }
   0x2   :  { %s2807_s29 = smov 0   ;;  %s2809_s30 = smov 0  }
   0x3   :  { %s2811_s9 = smov 0   ;;  %s2813_s10 = smov 0  }
   0x4 LB: > { %s2119_s11 = sadd.s32 4294967295, %s2751_s10   ;;  %s2120_s12 = sadd.s32 4294967294, %s2751_s10   ;;  %s2751_s10 = sphi %s2813_s10, %s21_s10   ;;  %s2747_s9 = sphi %s2811_s9, %s3521_s9   ;;  %s2743_s30 = sphi %s2809_s30, %s3520_s30   ;;  %s2739_s29 = sphi %s2807_s29, %s3519_s29   ;;  %s2735_s28 = sphi %s2805_s28, %s3518_s28   ;;  %s2731_s27 = sphi %s2803_s27, %s3517_s27  }
   0x5   : > { %s33_s13 = sadd.s32 1, %s2747_s9  ;;  %s213_s14 = sadd.s32 1, %s2739_s29 }
   0x6   : > { %p35_p0 = scmp.ge.s32.totalorder %s33_s13, 2  ;;  %p223_p1 = scmp.ne.s32.totalorder %s2739_s29, %s2735_s28 }
   0x7   : > { %p224_p2 = scmp.eq.s32.totalorder %s2119_s11, 1  ;;  %p229_p3 = scmp.ne.s32.totalorder %s2735_s28, %s2731_s27 }
   0x8   : > { %s3523_s13 = smov (%p35_p0, %s33_s13), 0  ;;  %p230_p5 = scmp.eq.s32.totalorder %s2120_s12, 1 }
   0x9   : > { %p2843_p4 = por %p224_p2, %p223_p1  ;;  %s210_s16 = ssub.s32 %s2747_s9, %s3523_s13 }
   0xa   : > { %p2123_p6 = scmp.ge.s32.totalorder %s2751_s10, 1  ;;  %p211_p7 = scmp.eq.s32.totalorder %s210_s16, 0 }
   0xb   : > { %p2850_p8 = por %p230_p5, %p229_p3  ;;  %p277_p9 = scmp.lt.s32.totalorder %s2751_s10, 3 }
   0xc   : > { %s2856_s18 = scalar_select %p211_p7, %s2739_s29, %s213_s14  }
   0xd   : > { %p278_p10 = pnand %p2123_p6, %p277_p9 }
   0xe   : > { %v2582_v0 = vld [vmem:[%s3503_s1 + $0x24] sm:$0xff] (!%p278_p10)   ;;  %v2753_v1 = vmov (!%p278_p10), 0.0   ;;  %v2584_v3 = vld [vmem:[%s3503_s1 + $0x2c] sm:$0xff] (!%p278_p10)   ;;  %p310_p11 = scmp.lt.s32.totalorder (!%p278_p10), %s2743_s30, 1  ;;  %vm2754_vm0 = vmmov (!%p278_p10), 0   ;;  %v2586_v5 = vld [vmem:[%s3503_s1 + $0x34] sm:$0xff] (!%p278_p10)  }
   0xf   : > { %281 = sbr.rel (%p278_p10) target bundleno = 1328 (0x530), region = 52  ;;  %2421 = vmatprep.subr.bf16.mxu0 (!%p278_p10), %v2753_v1  ;;  %320 = vst [vmem:[#allocation2] sm:$0x1] (!%p278_p10), %v2753_v1  ;;  %2435 = vmatprep.subr.bf16.mxu1 (!%p278_p10), %v2753_v1  ;;  %v2583_v2 = vld [vmem:[%s3503_s1] sm:$0xff] (!%p278_p10)   ;;  %v2585_v4 = vld [vmem:[%s3503_s1 + $0x8] sm:$0xff] (!%p278_p10)   ;;  %v2587_v6 = vld [vmem:[%s3503_s1 + $0x10] sm:$0xff] (!%p278_p10)  }
  0x10   : > { %2422 = vmatpush3.bf16.msra.mxu0 (!%p278_p10), %v2582_v0  ;;  %2436 = vmatpush3.bf16.msra.mxu1 (!%p278_p10), %v2583_v2  ;;  %v2588_v7 = vld [vmem:[%s3503_s1 + $0x3c] sm:$0xff] (!%p278_p10)   ;;  %v2590_v9 = vld [vmem:[%s3503_s1 + $0x44] ss:$0 sps:$4 sm:$0xff] (!%p278_p10)   ;;  %vm381_vm1 = vcmask (!%p278_p10), 1043456   ;;  %vm377_vm2 = vcmask (!%p278_p10), 588800   ;;  %v2592_v19 = vld [vmem:[%s3503_s1 + $0x48] sm:$0xff] (!%p278_p10)  }
  0x11   : > { %2423 = vmatprep.subr.bf16.mxu0 (!%p278_p10), %v2753_v1  ;;  %2437 = vmatprep.subr.bf16.mxu1 (!%p278_p10), %v2753_v1  ;;  %v2589_v8 = vld [vmem:[%s3503_s1 + $0x18] sm:$0xff] (!%p278_p10)   ;;  %v2591_v10 = vld [vmem:[%s3503_s1 + $0x20] ss:$0 sps:$4 sm:$0xff] (!%p278_p10)   ;;  %v383_v13 = vsel (!%p278_p10), %vm381_vm1, %v2590_v9, 0  ;;  %v2596_v17 = vld [vmem:[%s3503_s1 + $0x68] ss:$0 sps:$4 sm:$0xff] (!%p278_p10)  }
  0x12   : > { %2431 = vmatprep.mubr.msk.bf16.mxu0 (!%p278_p10), %vm2754_vm0, %v2753_v1  ;;  %2445 = vmatprep.mubr.msk.bf16.mxu1 (!%p278_p10), %vm2754_vm0, %v2753_v1  ;;  %v457_v14 = vsel (!%p278_p10), %vm381_vm1, %v2591_v10, 0  ;;  %v546_v20 = vsel (!%p278_p10), %vm381_vm1, %v2596_v17, 0  ;;  %v2593_v22 = vld [vmem:[%s3503_s1 + $0x50] sm:$0xff] (!%p278_p10)   ;;  %v2594_v23 = vld [vmem:[%s3503_s1 + $0x58] sm:$0xff] (!%p278_p10)   ;;  %v2595_v24 = vld [vmem:[%s3503_s1 + $0x60] sm:$0xff] (!%p278_p10)   ;;  %v2755_v31 = vmov (!%p278_p10), 0.0|0.0  }
  0x13   : > { %v616_v28 = vld [vmem:[%s3505_s3] sm:$0xff] (!%p278_p10)  ;;  %v617_v29 = vld [vmem:[%s3505_s3 + $0x8] sm:$0xff] (!%p278_p10)  ;;  %v618_v32 = vld [vmem:[%s3505_s3 + $0x10] sm:$0xff] (!%p278_p10)  ;;  %vm1997_vm8 = vcmask (!%p278_p10), 1040384   ;;  %s308_s24 = sand.u32 (!%p278_p10), 1, %s2735_s28   ;;  %s2295_s25 = sshll.u32 (!%p278_p10), %s2743_s30, 4 }
  0x14   : > { %2424 = vmatpush3.bf16.msra.mxu0 (!%p278_p10), %v2584_v3  ;;  %2438 = vmatpush3.bf16.msra.mxu1 (!%p278_p10), %v2585_v4  ;;  %v2499_v30 = vpack.c.bf16 (!%p278_p10), %v617_v29, %v616_v28  ;;  %v619_v33 = vld [vmem:[%s3505_s3 + $0x18] sm:$0xff] (!%p278_p10)  ;;  %v620_v35 = vld [vmem:[%s3505_s3 + $0x20] sm:$0xff] (!%p278_p10)  ;;  %v621_v36 = vld [vmem:[%s3505_s3 + $0x28] sm:$0xff] (!%p278_p10)  ;;  %s309_s26 = scalar_lea.vmem (!%p278_p10), [#allocation3], %s308_s24  ;;  %s3455_s19 = scalar_lea.hbm (!%p278_p10), %s3510_s8, %s2295_s25 }
  0x15   : > { %2425 = vmatprep.subr.bf16.mxu0 (!%p278_p10), %v2753_v1  ;;  %2439 = vmatprep.subr.bf16.mxu1 (!%p278_p10), %v2753_v1  ;;  %v2502_v34 = vpack.c.bf16 (!%p278_p10), %v619_v33, %v618_v32  ;;  %v2505_v37 = vpack.c.bf16 (!%p278_p10), %v621_v36, %v620_v35  ;;  %v622_v38 = vld [vmem:[%s3505_s3 + $0x30] sm:$0xff] (!%p278_p10)  ;;  %v623_v39 = vld [vmem:[%s3505_s3 + $0x38] sm:$0xff] (!%p278_p10)  ;;  %v624_v41 = vld [vmem:[%s3505_s3 + $0x40] sm:$0xff] (!%p278_p10) }
  0x16   : > { %s311_s11 = scalar_select %p310_p11, %s2743_s30, 1  ;;  %v2508_v40 = vpack.c.bf16 %v623_v39, %v622_v38  ;;  %v625_v42 = vld [vmem:[%s3505_s3 + $0x48] sm:$0xff]  ;;  %v626_v44 = vld [vmem:[%s3505_s3 + $0x50] sm:$0xff]  ;;  %v627_v45 = vld [vmem:[%s3505_s3 + $0x58] sm:$0xff] }
  0x17   : > { %v2511_v43 = vpack.c.bf16 %v625_v42, %v624_v41  ;;  %v2514_v46 = vpack.c.bf16 %v627_v45, %v626_v44  ;;  %v628_v47 = vld [vmem:[%s3505_s3 + $0x60] sm:$0xff]  ;;  %v629_v48 = vld [vmem:[%s3505_s3 + $0x68] sm:$0xff]  ;;  %v630_v50 = vld [vmem:[%s3505_s3 + $0x70] sm:$0xff]  ;;  %s2757_s30 = smov [#allocation3]  }
  0x18   : > { %s2522_s20 = smul.u32 24, %s311_s11  ;;  %2426 = vmatpush3.bf16.msra.mxu0 %v2586_v5  ;;  %2440 = vmatpush3.bf16.msra.mxu1 %v2587_v6  ;;  %v2517_v49 = vpack.c.bf16 %v629_v48, %v628_v47  ;;  %v631_v51 = vld [vmem:[%s3505_s3 + $0x78] sm:$0xff]  ;;  %v704_v53 = vld [vmem:[%s3506_s4] sm:$0xff]  ;;  %v3000_v55 = vld [vmem:[%s3506_s4 + $0x8] sm:$0xff]  ;;  %s2048_s11 = sshll.u32 %s309_s26, 4  ;;  %s3457_s11 = int_to_ptr.vmem [resolvable:$true] %s2048_s11 }
  0x19   : > { %2427 = vmatprep.subr.bf16.mxu0 %v2753_v1  ;;  %2441 = vmatprep.subr.bf16.mxu1 %v2753_v1  ;;  %v2520_v52 = vpack.c.bf16 %v631_v51, %v630_v50  ;;  %v708_v54 = vld [vmem:[%s3506_s4 + $0x20] sm:$0xff]  ;;  %v3005_v58 = vld [vmem:[%s3506_s4 + $0x28] sm:$0xff]  ;;  %s2673_s21 = scalar_lea.vmem %s3457_s11, 16  ;;  %s2677_s22 = sshll.u32 %s2757_s30, 4  ;;  %s2678_s22 = int_to_ptr.vmem [resolvable:$false] %s2677_s22 }
  0x1a   : > { %s2898_s12 = scalar_lea.vmem %s3502_s0, %s2522_s20  ;;  %v2166_v56 = vcombine.low %v704_v53, %v708_v54  ;;  %v2167_v57 = vcombine.high %v704_v53, %v708_v54  ;;  %v712_v59 = vld [vmem:[%s3506_s4 + $0x40] sm:$0xff]  ;;  %v2168_v61 = vcombine.low %v3000_v55, %v3005_v58  ;;  %v2169_v62 = vcombine.high %v3000_v55, %v3005_v58  ;;  %v713_v51 = vld [vmem:[%s3506_s4 + $0x48] sm:$0xff]  ;;  %s2036_s20 = scalar_lea.sflag [#allocation4], %s308_s24 }
  0x1b   : > { %v2125_v11 = vld [vmem:[%s2898_s12 + $0x1] sm:$0xff]  ;;  %v2126_v12 = vld [vmem:[%s2898_s12 + $0x9] sm:$0xff]  ;;  %v2165_v32 = vld [vmem:[%s3504_s2] ss:$0 sm:$0xff]  ;;  %p2674_p12 = scmp.ne.s32.totalorder %s3457_s11, %s2673_s21  ;;  %p2680_p1 = scmp.lt.s32.totalorder %s3457_s11, %s2678_s22 }
  0x1c   : > { %2428 = vmatpush3.bf16.msra.mxu0 %v2588_v7  ;;  %2442 = vmatpush3.bf16.msra.mxu1 %v2589_v8  ;;  %v323_v15 = vld [vmem:[%s2898_s12] sm:$0xff]  ;;  %v324_v16 = vld [vmem:[%s2898_s12 + $0x8] sm:$0xff]  ;;  %v339_v18 = vpack.c.bf16 %v2126_v12, %v2125_v11 }
  0x1d   : > { %2429 = vmatprep.subr.bf16.mxu0 %v2753_v1  ;;  %2443 = vmatprep.subr.bf16.mxu1 %v2753_v1  ;;  %v325_v21 = vpack.c.bf16 %v324_v16, %v323_v15  ;;  %v2148_v25 = vld [vmem:[%s2898_s12 + $0x2] sm:$0xff]  ;;  %v2149_v26 = vld [vmem:[%s2898_s12 + $0xa] sm:$0xff]  ;;  %v602_v48 = vld [vmem:[#allocation2] sm:$0x1]  ;;  %p2675_p13 = pnand %p2674_p12, %p2843_p4  ;;  %s2679_s12 = scalar_lea.vmem %s2678_s22, 32 }
  0x1e   : > { %v504_v27 = vpack.c.bf16 %v2149_v26, %v2148_v25  ;;  %v716_v60 = vld [vmem:[%s3506_s4 + $0x60] sm:$0xff]  ;;  %v737_v55 = vld [vmem:[%s3506_s4 + $0x108] sm:$0xff]  ;;  %p2681_p2 = scmp.lt.s32.totalorder %s2679_s12, %s2673_s21 }
  0x1f   : > { %v2175_v63 = vcombine.high %v712_v59, %v716_v60  ;;  %v2174_v0 = vcombine.low %v712_v59, %v716_v60  ;;  %v724_v2 = vld [vmem:[%s3506_s4 + $0xa0] sm:$0xff]  ;;  %v741_v58 = vld [vmem:[%s3506_s4 + $0x128] sm:$0xff]  ;;  %p2676_p0 = pneg %p2675_p13 }
  0x20   : > { %2430 = vmatpush3.bf16.msra.mxu0 %v383_v13  ;;  %2444 = vmatpush3.bf16.msra.mxu1 %v457_v14  ;;  %v728_v5 = vld [vmem:[%s3506_s4 + $0xc0] sm:$0xff]  ;;  %p2682_p3 = por %p2681_p2, %p2680_p1 }
  0x21   : > { %2449 = vmatprep.subr.bf16.mxu0 %v2753_v1  ;;  %2498 = vmatprep.subr.bf16.mxu1 %v2755_v31  ;;  %v732_v6 = vld [vmem:[%s3506_s4 + $0xe0] sm:$0xff] }
  0x22   : > { %v2191_v7 = vcombine.high %v728_v5, %v732_v6  ;;  %v2190_v8 = vcombine.low %v728_v5, %v732_v6  ;;  %v736_v9 = vld [vmem:[%s3506_s4 + $0x100] sm:$0xff]  ;;  %v2200_v5 = vcombine.low %v737_v55, %v741_v58  ;;  %p2683_p5 = pnand %p2682_p3, %p2676_p0 }
  0x23   : > { %2432 = vmatmul.mubr.msk.bf16.vlgmr.msra.gmra.mrb[0].mxu0 %vm377_vm2, %v339_v18  ;;  %2446 = vmatmul.mubr.msk.bf16.vlgmr.msra.gmra.mrb[0].mxu1 %vm377_vm2, %v325_v21  ;;  %v740_v10 = vld [vmem:[%s3506_s4 + $0x120] sm:$0xff] }
  0x24   : > { %2450 = vmatpush3.bf16.msra.mxu0 %v2592_v19  ;;  %2459 = vmatprep.mubr.msk.bf16.mxu0 %vm2754_vm0, %v2753_v1  ;;  %v2199_v11 = vcombine.high %v736_v9, %v740_v10  ;;  %v2198_v12 = vcombine.low %v736_v9, %v740_v10  ;;  %v744_v13 = vld [vmem:[%s3506_s4 + $0x140] sm:$0xff] }
  0x25   : > { %2451 = vmatprep.subr.bf16.mxu0 %v2753_v1  ;;  %2495 = vmatprep.mubr.msk.f32.mxu1 %vm2754_vm0, %v2753_v1  ;;  %v748_v14 = vld [vmem:[%s3506_s4 + $0x160] sm:$0xff] }
  0x26   : > { %2500 = vmatpush3.bf16.msra.mxu1 %v2499_v30  ;;  %v2207_v15 = vcombine.high %v744_v13, %v748_v14  ;;  %v2206_v16 = vcombine.low %v744_v13, %v748_v14  ;;  %v752_v17 = vld [vmem:[%s3506_s4 + $0x180] sm:$0xff]  ;;  %v761_v14 = vld [vmem:[%s3506_s4 + $0x1c8] sm:$0xff] }
  0x27   : > { %2501 = vmatprep.subr.bf16.mxu1 %v2755_v31  ;;  %v756_v18 = vld [vmem:[%s3506_s4 + $0x1a0] sm:$0xff] }
  0x28   : > { %2452 = vmatpush3.bf16.msra.mxu0 %v2593_v22  ;;  %v2215_v19 = vcombine.high %v752_v17, %v756_v18  ;;  %v764_v13 = vld [vmem:[%s3506_s4 + $0x1e0] sm:$0xff] }
  0x29   : > { %2453 = vmatprep.subr.bf16.mxu0 %v2753_v1 }
  0x2a   : > { %2503 = vmatpush3.bf16.msra.mxu1 %v2502_v34 }
  0x2b   : > { %2504 = vmatprep.subr.bf16.mxu1 %v2755_v31 }
  0x2c   : > { %2454 = vmatpush3.bf16.msra.mxu0 %v2594_v23 }
  0x2d   : > { %2455 = vmatprep.subr.bf16.mxu0 %v2753_v1 }
  0x2e   : > { %2506 = vmatpush3.bf16.msra.mxu1 %v2505_v37 }
  0x2f   : > { %2507 = vmatprep.subr.bf16.mxu1 %v2755_v31 }
  0x30   : > { %2456 = vmatpush3.bf16.msra.mxu0 %v2595_v24 }
  0x31   : > { %2457 = vmatprep.subr.bf16.mxu0 %v2753_v1  ;;  %v720_v1 = vld [vmem:[%s3506_s4 + $0x80] sm:$0xff] }
  0x32   : > { %2509 = vmatpush3.bf16.msra.mxu1 %v2508_v40  ;;  %v2183_v3 = vcombine.high %v720_v1, %v724_v2  ;;  %v2182_v4 = vcombine.low %v720_v1, %v724_v2  ;;  %v2201_v2 = vcombine.high %v737_v55, %v741_v58  ;;  %v746_v55 = vld [vmem:[%s3506_s4 + $0x150] sm:$0xff] }
  0x33   : > { %2510 = vmatprep.subr.bf16.mxu1 %v2755_v31  ;;  %v750_v58 = vld [vmem:[%s3506_s4 + $0x170] sm:$0xff] }
  0x34   : > { %2458 = vmatpush3.bf16.msra.mxu0 %v546_v20  ;;  %v2214_v20 = vcombine.low %v752_v17, %v756_v18 }
  0x35   : > { %1130 = vmatprep.subr.bf16.mxu0 %v2167_v57  ;;  %v725_v57 = vld [vmem:[%s3506_s4 + $0xa8] sm:$0xff] }
  0x36   : > { %2512 = vmatpush3.bf16.msra.mxu1 %v2511_v43 }
  0x37   : > { %2460 = vmatmul.mubr.msk.bf16.vlgmr.msra.gmra.mrb[4].mxu0 %vm377_vm2, %v504_v27  ;;  %2513 = vmatprep.subr.bf16.mxu1 %v2755_v31 }
  0x38   : > { %1131 = vmatpush1.bf16.msra.mxu0 %v2166_v56  ;;  %v721_v56 = vld [vmem:[%s3506_s4 + $0x88] sm:$0xff] }
  0x39   : > { %1132 = vmatprep.subr.bf16.mxu0 %v2175_v63  ;;  %v2185_v60 = vcombine.high %v721_v56, %v725_v57  ;;  %v733_v63 = vld [vmem:[%s3506_s4 + $0xe8] sm:$0xff] }
  0x3a   : > { %2515 = vmatpush3.bf16.msra.mxu1 %v2514_v46 }
  0x3b   : > { %2516 = vmatprep.subr.bf16.mxu1 %v2755_v31 }
  0x3c   : > { %1133 = vmatpush1.bf16.msra.mxu0 %v2174_v0  ;;  %v2184_v0 = vcombine.low %v721_v56, %v725_v57  ;;  %v738_v56 = vld [vmem:[%s3506_s4 + $0x110] sm:$0xff] }
  0x3d   : > { %1134 = vmatprep.subr.bf16.mxu0 %v2183_v3  ;;  %v745_v3 = vld [vmem:[%s3506_s4 + $0x148] sm:$0xff]  ;;  %v742_v57 = vld [vmem:[%s3506_s4 + $0x130] sm:$0xff] }
  0x3e   : > { %2518 = vmatpush3.bf16.msra.mxu1 %v2517_v49 }
  0x3f   : > { %2519 = vmatprep.subr.bf16.mxu1 %v2755_v31 }
  0x40   : > { %1135 = vmatpush1.bf16.msra.mxu0 %v2182_v4  ;;  %v749_v4 = vld [vmem:[%s3506_s4 + $0x168] sm:$0xff] }
  0x41   : > { %1136 = vmatprep.subr.bf16.mxu0 %v2191_v7  ;;  %v2209_v6 = vcombine.high %v745_v3, %v749_v4  ;;  %v753_v7 = vld [vmem:[%s3506_s4 + $0x188] sm:$0xff]  ;;  %v2208_v9 = vcombine.low %v745_v3, %v749_v4  ;;  %v2202_v3 = vcombine.low %v738_v56, %v742_v57 }
  0x42   : > { %2521 = vmatpush3.bf16.msra.mxu1 %v2520_v52  ;;  %v717_v52 = vld [vmem:[%s3506_s4 + $0x68] sm:$0xff] }
  0x43   : > { %1171 = vmatprep.subr.bf16.mxu1 %v2169_v62  ;;  %v2177_v53 = vcombine.high %v713_v51, %v717_v52  ;;  %v2176_v59 = vcombine.low %v713_v51, %v717_v52  ;;  %v729_v62 = vld [vmem:[%s3506_s4 + $0xc8] sm:$0xff] }
  0x44   : > { %1137 = vmatpush1.bf16.msra.mxu0 %v2190_v8  ;;  %v2193_v1 = vcombine.high %v729_v62, %v733_v63  ;;  %v757_v8 = vld [vmem:[%s3506_s4 + $0x1a8] sm:$0xff] }
  0x45   : > { %1138 = vmatprep.subr.bf16.mxu0 %v2199_v11  ;;  %v2217_v10 = vcombine.high %v753_v7, %v757_v8  ;;  %v2216_v11 = vcombine.low %v753_v7, %v757_v8  ;;  %v754_v7 = vld [vmem:[%s3506_s4 + $0x190] sm:$0xff] }
  0x46   : > { %v758_v8 = vld [vmem:[%s3506_s4 + $0x1b0] sm:$0xff] }
  0x48   : > { %1139 = vmatpush1.bf16.msra.mxu0 %v2198_v12  ;;  %v760_v12 = vld [vmem:[%s3506_s4 + $0x1c0] sm:$0xff] }
  0x49   : > { %1140 = vmatprep.subr.bf16.mxu0 %v2207_v15  ;;  %v2223_v15 = vcombine.high %v760_v12, %v764_v13  ;;  %v2222_v17 = vcombine.low %v760_v12, %v764_v13  ;;  %v2219_v13 = vcombine.high %v754_v7, %v758_v8 }
  0x4c   : > { %1141 = vmatpush1.bf16.msra.mxu0 %v2206_v16  ;;  %v765_v16 = vld [vmem:[%s3506_s4 + $0x1e8] sm:$0xff] }
  0x4d   : > { %1142 = vmatprep.subr.bf16.mxu0 %v2215_v19  ;;  %v2224_v18 = vcombine.low %v761_v14, %v765_v16  ;;  %v2225_v19 = vcombine.high %v761_v14, %v765_v16  ;;  %v766_v16 = vld [vmem:[%s3506_s4 + $0x1f0] sm:$0xff] }
  0x50   : > { %1143 = vmatpush1.bf16.msra.mxu0 %v2214_v20  ;;  %v706_v20 = vld [vmem:[%s3506_s4 + $0x10] sm:$0xff] }
  0x51   : > { %1144 = vmatprep.subr.bf16.mxu0 %v2223_v15  ;;  %v762_v15 = vld [vmem:[%s3506_s4 + $0x1d0] sm:$0xff] }
  0x54   : > { %1145 = vmatpush1.bf16.msra.mxu0 %v2222_v17  ;;  %v763_v17 = vld [vmem:[%s3506_s4 + $0x1d8] sm:$0xff] }
  0xf6   : > { %v419_v21 = vpop.f32.mrb[0].mxu0  ;;  %v493_v22 = vpop.f32.mrb[0].mxu1 }
  0xf7   : > { %v2433_v23 = vpop.f32.mrb[1].mxu0  ;;  %v494_v24 = vadd.f32 %v493_v22, %v419_v21  ;;  %v2447_v25 = vpop.f32.mrb[1].mxu1  ;;  %v710_v21 = vld [vmem:[%s3506_s4 + $0x30] sm:$0xff]  ;;  %v707_v22 = vld [vmem:[%s3506_s4 + $0x18] sm:$0xff] }
  0xf8   : > { %v422_v26 = vpop.f32.mrb[2].mxu0  ;;  %v496_v27 = vpop.f32.mrb[2].mxu1  ;;  %v2170_v23 = vcombine.low %v706_v20, %v710_v21  ;;  %v711_v25 = vld [vmem:[%s3506_s4 + $0x38] sm:$0xff] }
  0xf9   : > { %v2434_v28 = vpop.f32.mrb[3].mxu0  ;;  %v497_v29 = vadd.f32 %v496_v27, %v422_v26  ;;  %v2448_v30 = vpop.f32.mrb[3].mxu1  ;;  %v2756_v26 = vmov 0   ;;  %v2172_v27 = vcombine.low %v707_v22, %v711_v25 }
  0xfa   : > { %1162 = vmatprep.mubr.bf16.mxu0 %v2756_v26  ;;  %v2173_v28 = vcombine.high %v707_v22, %v711_v25  ;;  %v2597_v25 = vld [vmem:[%s3508_s6 + $0x40] sm:$0xff]  }
 0x10a   : > { %v582_v31 = vpop.f32.mrb[4].mxu0 }
 0x10b   : > { %v589_v33 = vadd.f32 %v582_v31, %v494_v24  ;;  %v2461_v34 = vpop.f32.mrb[5].mxu0  ;;  %v2171_v24 = vcombine.high %v706_v20, %v710_v21  ;;  %v718_v31 = vld [vmem:[%s3506_s4 + $0x70] sm:$0xff]  ;;  %v2227_v21 = vcombine.high %v762_v15, %v766_v16 }
 0x10c   : > { %v585_v35 = vpop.f32.mrb[6].mxu0 }
 0x10d   : > { %v598_v36 = vadd.f32 %v2165_v32, %v589_v33  ;;  %v590_v37 = vadd.f32 %v585_v35, %v497_v29  ;;  %v2462_v38 = vpop.f32.mrb[7].mxu0  ;;  %1212 = vmatprep.subr.bf16.mxu0 %v2171_v24  ;;  %v714_v29 = vld [vmem:[%s3506_s4 + $0x50] sm:$0xff]  ;;  %v719_v33 = vld [vmem:[%s3506_s4 + $0x78] sm:$0xff] }
 0x10f   : > { %v599_v39 = vadd.f32 %v2165_v32, %v590_v37  ;;  %v600_v40 = vmax.f32 %v598_v36, 0.0  ;;  %v715_v32 = vld [vmem:[%s3506_s4 + $0x58] sm:$0xff]  ;;  %v2179_v37 = vcombine.high %v714_v29, %v718_v31 }
 0x110   : > { %v2181_v38 = vcombine.high %v715_v32, %v719_v33 }
 0x111   : > { %v601_v41 = vmax.f32 %v599_v39, 0.0  ;;  %v722_v39 = vld [vmem:[%s3506_s4 + $0x90] sm:$0xff] }
 0x113   : > { %v603_v42 = vadd.f32 %v601_v41, %v600_v40  ;;  %v726_v40 = vld [vmem:[%s3506_s4 + $0xb0] sm:$0xff]  ;;  %v723_v41 = vld [vmem:[%s3506_s4 + $0x98] sm:$0xff] }
 0x114   : > { %v2186_v51 = vcombine.low %v722_v39, %v726_v40 }
 0x115   : > { %v604_v43 = vrot.slane %v603_v42, 4 }
 0x117   : > { %v605_v44 = vadd.f32 %v604_v43, %v603_v42  ;;  %v727_v42 = vld [vmem:[%s3506_s4 + $0xb8] sm:$0xff]  ;;  %v2178_v43 = vcombine.low %v714_v29, %v718_v31  ;;  %v2601_v29 = vld [vmem:[%s3508_s6 + $0x48] sm:$0xff]  }
 0x118   : > { %v2188_v52 = vcombine.low %v723_v41, %v727_v42  ;;  %v2603_v31 = vld [vmem:[%s3508_s6 + $0x8] sm:$0xff]  }
 0x119   : > { %v606_v45 = vrot.slane %v605_v44, 2 }
 0x11b   : > { %v607_v46 = vadd.f32 %v606_v45, %v605_v44  ;;  %v2180_v44 = vcombine.low %v715_v32, %v719_v33  ;;  %v2187_v45 = vcombine.high %v722_v39, %v726_v40  ;;  %v2604_v32 = vld [vmem:[%s3508_s6 + $0x88] sm:$0xff]   ;;  %v2605_v33 = vld [vmem:[%s3508_s6 + $0x50] sm:$0xff]   ;;  %v2611_v39 = vld [vmem:[%s3508_s6 + $0x18] sm:$0xff]  }
 0x11c   : > { %v2612_v40 = vld [vmem:[%s3508_s6 + $0x98] sm:$0xff]  }
 0x11d   : > { %v608_v47 = vrot.slane %v607_v46, 1 }
 0x11f   : > { %v609_v49 = vadd.f32 %v608_v47, %v607_v46  ;;  %v2189_v46 = vcombine.high %v723_v41, %v727_v42  ;;  %v730_v47 = vld [vmem:[%s3506_s4 + $0xd0] sm:$0xff]  ;;  %v2613_v41 = vld [vmem:[%s3508_s6 + $0x60] sm:$0xff]  }
 0x120   : > { %v2614_v42 = vld [vmem:[%s3508_s6 + $0xe0] sm:$0xff]  }
 0x121   : > { %v610_v50 = vadd.f32 %v609_v49, %v602_v48  ;;  %v734_v48 = vld [vmem:[%s3506_s4 + $0xf0] sm:$0xff]  ;;  %v731_v49 = vld [vmem:[%s3506_s4 + $0xd8] sm:$0xff] }
 0x123   : > { %611 = vst [vmem:[#allocation2] sm:$0x1] %v610_v50  ;;  %v735_v50 = vld [vmem:[%s3506_s4 + $0xf8] sm:$0xff] }
 0x12a   : > { %v615_v54 = vld [vmem:[#allocation2] sm:$0x1] }
 0x12b   : > { %2496 = vmatmul.mubr.f32.vlgmr.msra.gmra.mrb[4].mxu1 %v615_v54  ;;  %v2197_v54 = vcombine.high %v731_v49, %v735_v50 }
 0x12c   : > { %1172 = vmatpush1.bf16.msra.mxu1 %v2168_v61  ;;  %v2192_v61 = vcombine.low %v729_v62, %v733_v63  ;;  %1203 = vmatprep.mubr.bf16.mxu1 %v2756_v26  ;;  %v2194_v62 = vcombine.low %v730_v47, %v734_v48  ;;  %v2196_v63 = vcombine.low %v731_v49, %v735_v50  ;;  %v2621_v49 = vld [vmem:[%s3508_s6 + $0x70] sm:$0xff]  }
 0x12d   : > { %1173 = vmatprep.subr.bf16.mxu1 %v2177_v53  ;;  %v2195_v53 = vcombine.high %v730_v47, %v734_v48  ;;  %v2619_v47 = vld [vmem:[%s3508_s6 + $0x28] sm:$0xff]   ;;  %v2622_v50 = vld [vmem:[%s3508_s6 + $0xf0] sm:$0xff]  }
 0x12e   : > { %v2620_v48 = vld [vmem:[%s3508_s6 + $0xa8] sm:$0xff]  }
 0x130   : > { %1174 = vmatpush1.bf16.msra.mxu1 %v2176_v59  ;;  %v739_v59 = vld [vmem:[%s3506_s4 + $0x118] sm:$0xff] }
 0x131   : > { %1175 = vmatprep.subr.bf16.mxu1 %v2185_v60  ;;  %v743_v60 = vld [vmem:[%s3506_s4 + $0x138] sm:$0xff] }
 0x132   : > { %v2204_v4 = vcombine.low %v739_v59, %v743_v60 }
 0x134   : > { %1176 = vmatpush1.bf16.msra.mxu1 %v2184_v0  ;;  %v2203_v0 = vcombine.high %v738_v56, %v742_v57  ;;  %v2627_v56 = vld [vmem:[%s3508_s6 + $0x38] sm:$0xff]  }
 0x135   : > { %1177 = vmatprep.subr.bf16.mxu1 %v2193_v1  ;;  %v2205_v1 = vcombine.high %v739_v59, %v743_v60  ;;  %v2628_v57 = vld [vmem:[%s3508_s6 + $0xb8] sm:$0xff]   ;;  %v2629_v59 = vld [vmem:[%s3508_s6 + $0x140] sm:$0xff]  }
 0x136   : > { %v2630_v60 = vld [vmem:[%s3508_s6 + $0x1c0] sm:$0xff]  }
 0x138   : > { %1178 = vmatpush1.bf16.msra.mxu1 %v2192_v61  ;;  %v747_v61 = vld [vmem:[%s3506_s4 + $0x158] sm:$0xff] }
 0x139   : > { %1179 = vmatprep.subr.bf16.mxu1 %v2201_v2  ;;  %v751_v2 = vld [vmem:[%s3506_s4 + $0x178] sm:$0xff] }
 0x13a   : > { %v2212_v12 = vcombine.low %v747_v61, %v751_v2 }
 0x13c   : > { %1180 = vmatpush1.bf16.msra.mxu1 %v2200_v5  ;;  %v2211_v5 = vcombine.high %v746_v55, %v750_v58 }
 0x13d   : > { %1181 = vmatprep.subr.bf16.mxu1 %v2209_v6  ;;  %v2213_v6 = vcombine.high %v747_v61, %v751_v2 }
 0x140   : > { %1182 = vmatpush1.bf16.msra.mxu1 %v2208_v9  ;;  %v755_v9 = vld [vmem:[%s3506_s4 + $0x198] sm:$0xff] }
 0x141   : > { %1183 = vmatprep.subr.bf16.mxu1 %v2217_v10  ;;  %v759_v10 = vld [vmem:[%s3506_s4 + $0x1b8] sm:$0xff] }
 0x142   : > { %v2221_v14 = vcombine.high %v755_v9, %v759_v10  ;;  %v2220_v20 = vcombine.low %v755_v9, %v759_v10 }
 0x144   : > { %1184 = vmatpush1.bf16.msra.mxu1 %v2216_v11  ;;  %v2210_v11 = vcombine.low %v746_v55, %v750_v58  ;;  %v3313_v55 = vld [vmem:[%s3507_s5] sm:$0xff] }
 0x145   : > { %1185 = vmatprep.subr.bf16.mxu1 %v2225_v19  ;;  %v2218_v19 = vcombine.low %v754_v7, %v758_v8 }
 0x148   : > { %1186 = vmatpush1.bf16.msra.mxu1 %v2224_v18  ;;  %v767_v18 = vld [vmem:[%s3506_s4 + $0x1f8] sm:$0xff] }
 0x149   : > { %1253 = vmatprep.subr.bf16.mxu1 %v2173_v28  ;;  %v2229_v22 = vcombine.high %v763_v17, %v767_v18  ;;  %v2228_v24 = vcombine.low %v763_v17, %v767_v18  ;;  %v2600_v28 = vld [vmem:[%s3508_s6 + $0x80] sm:$0xff]  }
 0x1fe   : > { %v698_v30 = vpop.f32.mrb[4].mxu1 }
 0x1ff   : > { %v702_v34 = vmul.f32 0.00390625, %v698_v30  ;;  %v2497_v35 = vpop.f32.mrb[5].mxu1  ;;  %v2602_v30 = vld [vmem:[%s3508_s6 + $0xc8] sm:$0xff]  }
 0x200   : > { %v2607_v35 = vld [vmem:[%s3508_s6 + $0x10] sm:$0xff]  }
 0x201   : > { %v3125_v36 = vpack.c.bf16 %v702_v34, %v702_v34  ;;  %v2606_v34 = vld [vmem:[%s3508_s6 + $0xd0] sm:$0xff]  }
 0x203   : > { %1163 = vmatmul.mubr.bf16.vlgmr.msra.gmra.mrb[8].mxu0 %v3125_v36  ;;  %1204 = vmatmul.mubr.bf16.vlgmr.msra.gmra.mrb[8].mxu1 %v3125_v36 }
 0x204   : > { %1213 = vmatpush1.bf16.msra.mxu0 %v2170_v23  ;;  %1254 = vmatpush1.bf16.msra.mxu1 %v2172_v27  ;;  %v2226_v23 = vcombine.low %v762_v15, %v766_v16  ;;  %v2599_v27 = vld [vmem:[%s3508_s6] sm:$0xff]  }
 0x205   : > { %1214 = vmatprep.subr.bf16.mxu0 %v2179_v37  ;;  %1255 = vmatprep.subr.bf16.mxu1 %v2181_v38  ;;  %v2609_v37 = vld [vmem:[%s3508_s6 + $0x58] sm:$0xff]  }
 0x206   : > { %1244 = vmatprep.mubr.bf16.mxu0 %v2756_v26  ;;  %1285 = vmatprep.mubr.bf16.mxu1 %v2756_v26  ;;  %v2598_v26 = vld [vmem:[%s3508_s6 + $0xc0] sm:$0xff]   ;;  %v2610_v38 = vld [vmem:[%s3508_s6 + $0xd8] sm:$0xff]  }
 0x208   : > { %1215 = vmatpush1.bf16.msra.mxu0 %v2178_v43  ;;  %1256 = vmatpush1.bf16.msra.mxu1 %v2180_v44  ;;  %v2615_v43 = vld [vmem:[%s3508_s6 + $0x20] sm:$0xff]  }
 0x209   : > { %1216 = vmatprep.subr.bf16.mxu0 %v2187_v45  ;;  %1257 = vmatprep.subr.bf16.mxu1 %v2189_v46  ;;  %v2616_v44 = vld [vmem:[%s3508_s6 + $0xa0] sm:$0xff]   ;;  %v2617_v45 = vld [vmem:[%s3508_s6 + $0x68] sm:$0xff]  }
 0x20a   : > { %v2618_v46 = vld [vmem:[%s3508_s6 + $0xe8] sm:$0xff]  }
 0x20c   : > { %1217 = vmatpush1.bf16.msra.mxu0 %v2186_v51  ;;  %1258 = vmatpush1.bf16.msra.mxu1 %v2188_v52  ;;  %v2623_v51 = vld [vmem:[%s3508_s6 + $0x30] sm:$0xff]  }
 0x20d   : > { %1218 = vmatprep.subr.bf16.mxu0 %v2195_v53  ;;  %1259 = vmatprep.subr.bf16.mxu1 %v2197_v54  ;;  %v2624_v52 = vld [vmem:[%s3508_s6 + $0xb0] sm:$0xff]   ;;  %v2625_v53 = vld [vmem:[%s3508_s6 + $0x78] sm:$0xff]  }
 0x20e   : > { %v2626_v54 = vld [vmem:[%s3508_s6 + $0xf8] sm:$0xff]  }
 0x210   : > { %1219 = vmatpush1.bf16.msra.mxu0 %v2194_v62  ;;  %1260 = vmatpush1.bf16.msra.mxu1 %v2196_v63  ;;  %v1090_v62 = vlaneseq }
 0x211   : > { %1220 = vmatprep.subr.bf16.mxu0 %v2203_v0  ;;  %1261 = vmatprep.subr.bf16.mxu1 %v2205_v1 }
 0x212   : > { %v3306_v63 = vshrl.u32 %v1090_v62, 7 }
 0x214   : > { %1221 = vmatpush1.bf16.msra.mxu0 %v2202_v3  ;;  %1262 = vmatpush1.bf16.msra.mxu1 %v2204_v4  ;;  %v1092_v0 = vsub.s32 0, %v3306_v63  ;;  %v1100_v1 = vsub.s32 2, %v3306_v63  ;;  %v1096_v58 = vsub.s32 1, %v3306_v63  ;;  %v1104_v61 = vsub.s32 3, %v3306_v63 }
 0x215   : > { %1222 = vmatprep.subr.bf16.mxu0 %v2211_v5  ;;  %1263 = vmatprep.subr.bf16.mxu1 %v2213_v6 }
 0x216   : > { %v1093_v2 = vrot.slane %v3313_v55, %v1092_v0  ;;  %v1101_v3 = vrot.slane %v3313_v55, %v1100_v1  ;;  %v1097_v4 = vrot.slane %v3313_v55, %v1096_v58  ;;  %v1105_v5 = vrot.slane %v3313_v55, %v1104_v61  ;;  %v2657_v0 = vld [vmem:[%s3508_s6 + $0x178] sm:$0xff]  }
 0x217   : > { %v2658_v1 = vld [vmem:[%s3508_s6 + $0x1f8] sm:$0xff]  }
 0x218   : > { %1223 = vmatpush1.bf16.msra.mxu0 %v2210_v11  ;;  %1264 = vmatpush1.bf16.msra.mxu1 %v2212_v12 }
 0x219   : > { %1224 = vmatprep.subr.bf16.mxu0 %v2219_v13  ;;  %1265 = vmatprep.subr.bf16.mxu1 %v2221_v14 }
 0x21c   : > { %1225 = vmatpush1.bf16.msra.mxu0 %v2218_v19  ;;  %1266 = vmatpush1.bf16.msra.mxu1 %v2220_v20 }
 0x21d   : > { %1226 = vmatprep.subr.bf16.mxu0 %v2227_v21  ;;  %1267 = vmatprep.subr.bf16.mxu1 %v2229_v22 }
 0x220   : > { %1227 = vmatpush1.bf16.msra.mxu0 %v2226_v23  ;;  %1268 = vmatpush1.bf16.msra.mxu1 %v2228_v24  ;;  %v2631_v24 = vld [vmem:[%s3508_s6 + $0x100] sm:$0xff]  }
 0x221   : > { %2333 = vmatprep.subr.bf16.mxu0 %v2597_v25  ;;  %2355 = vmatprep.subr.bf16.mxu1 %v2598_v26  ;;  %v2632_v25 = vld [vmem:[%s3508_s6 + $0x180] sm:$0xff]  }
 0x223   : > { %1245 = vmatmul.mubr.bf16.vlgmr.msra.gmra.mrb[12].mxu0 %v3125_v36  ;;  %1286 = vmatmul.mubr.bf16.vlgmr.msra.gmra.mrb[12].mxu1 %v3125_v36  ;;  %v2608_v36 = vld [vmem:[%s3508_s6 + $0x90] sm:$0xff]  }
 0x224   : > { %2334 = vmatpush3.bf16.msra.mxu0 %v2599_v27  ;;  %2356 = vmatpush3.bf16.msra.mxu1 %v2600_v28  ;;  %v2633_v28 = vld [vmem:[%s3508_s6 + $0x148] sm:$0xff]  }
 0x225   : > { %2335 = vmatprep.subr.bf16.mxu0 %v2601_v29  ;;  %2357 = vmatprep.subr.bf16.mxu1 %v2602_v30  ;;  %v2634_v29 = vld [vmem:[%s3508_s6 + $0x1c8] sm:$0xff]  }
 0x226   : > { %v2635_v30 = vld [vmem:[%s3508_s6 + $0x108] sm:$0xff]  }
 0x228   : > { %2336 = vmatpush3.bf16.msra.mxu0 %v2603_v31  ;;  %2358 = vmatpush3.bf16.msra.mxu1 %v2604_v32  ;;  %v2636_v31 = vld [vmem:[%s3508_s6 + $0x188] sm:$0xff]   ;;  %v2637_v32 = vld [vmem:[%s3508_s6 + $0x150] sm:$0xff]  }
 0x229   : > { %2337 = vmatprep.subr.bf16.mxu0 %v2605_v33  ;;  %2359 = vmatprep.subr.bf16.mxu1 %v2606_v34  ;;  %v2638_v33 = vld [vmem:[%s3508_s6 + $0x1d0] sm:$0xff]  }
 0x22a   : > { %v2639_v34 = vld [vmem:[%s3508_s6 + $0x110] sm:$0xff]  }
 0x22c   : > { %2338 = vmatpush3.bf16.msra.mxu0 %v2607_v35  ;;  %2360 = vmatpush3.bf16.msra.mxu1 %v2608_v36  ;;  %v2640_v35 = vld [vmem:[%s3508_s6 + $0x190] sm:$0xff]   ;;  %v2641_v36 = vld [vmem:[%s3508_s6 + $0x158] sm:$0xff]  }
 0x22d   : > { %2339 = vmatprep.subr.bf16.mxu0 %v2609_v37  ;;  %2361 = vmatprep.subr.bf16.mxu1 %v2610_v38  ;;  %v2642_v37 = vld [vmem:[%s3508_s6 + $0x1d8] sm:$0xff]  }
 0x22e   : > { %v2643_v38 = vld [vmem:[%s3508_s6 + $0x118] sm:$0xff]  }
 0x230   : > { %2340 = vmatpush3.bf16.msra.mxu0 %v2611_v39  ;;  %2362 = vmatpush3.bf16.msra.mxu1 %v2612_v40  ;;  %v2644_v39 = vld [vmem:[%s3508_s6 + $0x198] sm:$0xff]   ;;  %v2645_v40 = vld [vmem:[%s3508_s6 + $0x160] sm:$0xff]  }
 0x231   : > { %2341 = vmatprep.subr.bf16.mxu0 %v2613_v41  ;;  %2363 = vmatprep.subr.bf16.mxu1 %v2614_v42  ;;  %v2646_v41 = vld [vmem:[%s3508_s6 + $0x1e0] sm:$0xff]  }
 0x232   : > { %v2647_v42 = vld [vmem:[%s3508_s6 + $0x120] sm:$0xff]  }
 0x234   : > { %2342 = vmatpush3.bf16.msra.mxu0 %v2615_v43  ;;  %2364 = vmatpush3.bf16.msra.mxu1 %v2616_v44  ;;  %v2648_v43 = vld [vmem:[%s3508_s6 + $0x1a0] sm:$0xff]   ;;  %v2649_v44 = vld [vmem:[%s3508_s6 + $0x168] sm:$0xff]  }
 0x235   : > { %2343 = vmatprep.subr.bf16.mxu0 %v2617_v45  ;;  %2365 = vmatprep.subr.bf16.mxu1 %v2618_v46  ;;  %v2650_v45 = vld [vmem:[%s3508_s6 + $0x1e8] sm:$0xff]   ;;  %v1108_v46 = vsub.s32 4, %v3306_v63 }
 0x238   : > { %2344 = vmatpush3.bf16.msra.mxu0 %v2619_v47  ;;  %2366 = vmatpush3.bf16.msra.mxu1 %v2620_v48  ;;  %v1116_v47 = vsub.s32 6, %v3306_v63  ;;  %v2651_v48 = vld [vmem:[%s3508_s6 + $0x128] sm:$0xff]  }
 0x239   : > { %2345 = vmatprep.subr.bf16.mxu0 %v2621_v49  ;;  %2367 = vmatprep.subr.bf16.mxu1 %v2622_v50  ;;  %v2652_v49 = vld [vmem:[%s3508_s6 + $0x1a8] sm:$0xff]   ;;  %v1112_v50 = vsub.s32 5, %v3306_v63 }
 0x23c   : > { %2346 = vmatpush3.bf16.msra.mxu0 %v2623_v51  ;;  %2368 = vmatpush3.bf16.msra.mxu1 %v2624_v52  ;;  %v1120_v51 = vsub.s32 7, %v3306_v63  ;;  %v2653_v52 = vld [vmem:[%s3508_s6 + $0x170] sm:$0xff]  }
 0x23d   : > { %2347 = vmatprep.subr.bf16.mxu0 %v2625_v53  ;;  %2369 = vmatprep.subr.bf16.mxu1 %v2626_v54  ;;  %v2654_v53 = vld [vmem:[%s3508_s6 + $0x1f0] sm:$0xff]   ;;  %v1109_v54 = vrot.slane %v3313_v55, %v1108_v46 }
 0x23e   : > { %v2656_v63 = vld [vmem:[%s3508_s6 + $0x1b0] sm:$0xff]  }
 0x240   : > { %2348 = vmatpush3.bf16.msra.mxu0 %v2627_v56  ;;  %2370 = vmatpush3.bf16.msra.mxu1 %v2628_v57  ;;  %v1117_v56 = vrot.slane %v3313_v55, %v1116_v47  ;;  %v1113_v57 = vrot.slane %v3313_v55, %v1112_v50 }
 0x241   : > { %2377 = vmatprep.subr.bf16.mxu0 %v2629_v59  ;;  %2399 = vmatprep.subr.bf16.mxu1 %v2630_v60  ;;  %v1121_v59 = vrot.slane %v3313_v55, %v1120_v51  ;;  %v2655_v60 = vld [vmem:[%s3508_s6 + $0x130] sm:$0xff]  }
 0x2d6   : > { %v1164_v6 = vpop.f32.mrb[8].mxu0  ;;  %v1205_v7 = vpop.f32.mrb[8].mxu1 }
 0x2d7   : > { %v1165_v8 = vadd.f32 %v1164_v6, %v1093_v2  ;;  %v1206_v9 = vadd.f32 %v1205_v7, %v1101_v3  ;;  %v1166_v10 = vpop.f32.mrb[9].mxu0  ;;  %v1207_v11 = vpop.f32.mrb[9].mxu1 }
 0x2d8   : > { %v1167_v12 = vadd.f32 %v1166_v10, %v1097_v4  ;;  %v1208_v13 = vadd.f32 %v1207_v11, %v1105_v5  ;;  %v1168_v14 = vpop.f32.mrb[10].mxu0  ;;  %v1209_v15 = vpop.f32.mrb[10].mxu1  ;;  %v2660_v10 = vld [vmem:[%s3508_s6 + $0x1b8] sm:$0xff]  }
 0x2d9   : > { %v1294_v16 = vmax.f32 %v1165_v8, 0.0  ;;  %v1296_v17 = vmax.f32 %v1206_v9, 0.0  ;;  %v1169_v18 = vpop.f32.mrb[11].mxu0  ;;  %v1210_v19 = vpop.f32.mrb[11].mxu1  ;;  %v2659_v9 = vld [vmem:[%s3508_s6 + $0x138] sm:$0xff]  }
 0x2da   : > { %v1295_v20 = vmax.f32 %v1167_v12, 0.0  ;;  %v1297_v21 = vmax.f32 %v1208_v13, 0.0 }
 0x2db   : > { %v1302_v26 = vpack.c.bf16 %v1294_v16, %v1294_v16  ;;  %v1304_v27 = vpack.c.bf16 %v1296_v17, %v1296_v17 }
 0x2dc   : > { %v1303_v22 = vpack.c.bf16 %v1295_v20, %v1295_v20  ;;  %v1305_v23 = vpack.c.bf16 %v1297_v21, %v1297_v21 }
 0x2de   : > { %1855 = vmatprep.mubr.bf16.mxu0 %v1303_v22  ;;  %1895 = vmatprep.mubr.bf16.mxu1 %v1305_v23  ;;  %v1438_v23 = vld [vmem:[%s3509_s7] sm:$0x1] }
 0x2df   : > { %1856 = vmatmul.mubr.bf16.vlgmr.msra.gmra.mrb[16].mxu0 %v1302_v26  ;;  %1896 = vmatmul.mubr.bf16.vlgmr.msra.gmra.mrb[16].mxu1 %v1304_v27 }
 0x2e0   : > { %2378 = vmatpush3.bf16.msra.mxu0 %v2631_v24  ;;  %2400 = vmatpush3.bf16.msra.mxu1 %v2632_v25 }
 0x2e1   : > { %2379 = vmatprep.subr.bf16.mxu0 %v2633_v28  ;;  %2401 = vmatprep.subr.bf16.mxu1 %v2634_v29 }
 0x2e4   : > { %2380 = vmatpush3.bf16.msra.mxu0 %v2635_v30  ;;  %2402 = vmatpush3.bf16.msra.mxu1 %v2636_v31 }
 0x2e5   : > { %2381 = vmatprep.subr.bf16.mxu0 %v2637_v32  ;;  %2403 = vmatprep.subr.bf16.mxu1 %v2638_v33 }
 0x2e8   : > { %2382 = vmatpush3.bf16.msra.mxu0 %v2639_v34  ;;  %2404 = vmatpush3.bf16.msra.mxu1 %v2640_v35  ;;  %v3423_v34 = vand.u32 127, %v1090_v62 }
 0x2e9   : > { %2383 = vmatprep.subr.bf16.mxu0 %v2641_v36  ;;  %2405 = vmatprep.subr.bf16.mxu1 %v2642_v37 }
 0x2ea   : > { %vm1993_vm3 = vcmp.ge.s32.totalorder %v3423_v34, 7  ;;  %vm1994_vm4 = vcmp.lt.s32.totalorder %v3423_v34, 13  ;;  %vm2014_vm5 = vcmp.ge.s32.totalorder %v3423_v34, 13  ;;  %vm2015_vm6 = vcmp.lt.s32.totalorder %v3423_v34, 17 }
 0x2eb   : > { %vm3429_vm7 = vmand %vm1993_vm3, %vm1994_vm4  ;;  %vm1985_vm10 = vcmp.lt.s32.totalorder %v3423_v34, 7 }
 0x2ec   : > { %2384 = vmatpush3.bf16.msra.mxu0 %v2643_v38  ;;  %2406 = vmatpush3.bf16.msra.mxu1 %v2644_v39  ;;  %vm3433_vm9 = vmand %vm2014_vm5, %vm2015_vm6 }
 0x2ed   : > { %2385 = vmatprep.subr.bf16.mxu0 %v2645_v40  ;;  %2407 = vmatprep.subr.bf16.mxu1 %v2646_v41 }
 0x2f0   : > { %2386 = vmatpush3.bf16.msra.mxu0 %v2647_v42  ;;  %2408 = vmatpush3.bf16.msra.mxu1 %v2648_v43 }
 0x2f1   : > { %2387 = vmatprep.subr.bf16.mxu0 %v2649_v44  ;;  %2409 = vmatprep.subr.bf16.mxu1 %v2650_v45 }
 0x2f4   : > { %2388 = vmatpush3.bf16.msra.mxu0 %v2651_v48  ;;  %2410 = vmatpush3.bf16.msra.mxu1 %v2652_v49 }
 0x2f5   : > { %2389 = vmatprep.subr.bf16.mxu0 %v2653_v52  ;;  %2411 = vmatprep.subr.bf16.mxu1 %v2654_v53 }
 0x2f6   : > { %v1246_v58 = vpop.f32.mrb[12].mxu0  ;;  %v1287_v55 = vpop.f32.mrb[12].mxu1 }
 0x2f7   : > { %v1247_v61 = vadd.f32 %v1246_v58, %v1109_v54  ;;  %v1288_v2 = vadd.f32 %v1287_v55, %v1117_v56  ;;  %v1248_v3 = vpop.f32.mrb[13].mxu0  ;;  %v1289_v4 = vpop.f32.mrb[13].mxu1 }
 0x2f8   : > { %v1249_v5 = vadd.f32 %v1248_v3, %v1113_v57  ;;  %v1290_v6 = vadd.f32 %v1289_v4, %v1121_v59  ;;  %v1250_v7 = vpop.f32.mrb[14].mxu0  ;;  %v1291_v8 = vpop.f32.mrb[14].mxu1  ;;  %2390 = vmatpush3.bf16.msra.mxu0 %v2655_v60  ;;  %2412 = vmatpush3.bf16.msra.mxu1 %v2656_v63 }
 0x2f9   : > { %v1298_v11 = vmax.f32 %v1247_v61, 0.0  ;;  %v1300_v12 = vmax.f32 %v1288_v2, 0.0  ;;  %v1251_v13 = vpop.f32.mrb[15].mxu0  ;;  %v1292_v14 = vpop.f32.mrb[15].mxu1  ;;  %2391 = vmatprep.subr.bf16.mxu0 %v2657_v0  ;;  %2413 = vmatprep.subr.bf16.mxu1 %v2658_v1 }
 0x2fa   : > { %v1299_v15 = vmax.f32 %v1249_v5, 0.0  ;;  %v1301_v16 = vmax.f32 %v1290_v6, 0.0 }
 0x2fb   : > { %v1306_v19 = vpack.c.bf16 %v1298_v11, %v1298_v11  ;;  %v1308_v20 = vpack.c.bf16 %v1300_v12, %v1300_v12 }
 0x2fc   : > { %v1307_v17 = vpack.c.bf16 %v1299_v15, %v1299_v15  ;;  %v1309_v18 = vpack.c.bf16 %v1301_v16, %v1301_v16  ;;  %2392 = vmatpush3.bf16.msra.mxu0 %v2659_v9  ;;  %2414 = vmatpush3.bf16.msra.mxu1 %v2660_v10 }
 0x2fe   : > { %1935 = vmatprep.mubr.bf16.mxu0 %v1307_v17  ;;  %1975 = vmatprep.mubr.bf16.mxu1 %v1309_v18 }
 0x2ff   : > { %1936 = vmatmul.mubr.bf16.vlgmr.msra.gmra.mrb[20].mxu0 %v1306_v19  ;;  %1976 = vmatmul.mubr.bf16.vlgmr.msra.gmra.mrb[20].mxu1 %v1308_v20 }
 0x3b2   : > { %v2349_v21 = vpop.f32.mrb[16].mxu0  ;;  %v2371_v22 = vpop.f32.mrb[16].mxu1 }
 0x3b3   : > { %v2350_v24 = vpop.f32.mrb[17].mxu0  ;;  %v2372_v25 = vpop.f32.mrb[17].mxu1 }
 0x3b4   : > { %v2351_v26 = vadd.f32 %v2350_v24, %v2349_v21  ;;  %v2373_v27 = vadd.f32 %v2372_v25, %v2371_v22  ;;  %v2352_v28 = vpop.f32.mrb[18].mxu0  ;;  %v2374_v29 = vpop.f32.mrb[18].mxu1 }
 0x3b5   : > { %v2353_v30 = vpop.f32.mrb[19].mxu0  ;;  %v2375_v31 = vpop.f32.mrb[19].mxu1 }
 0x3b6   : > { %v1858_v32 = vadd.f32 %v2351_v26, %v1438_v23 }
 0x3b8   : > { %v1898_v33 = vadd.f32 %v2373_v27, %v1858_v32 }
 0x3d2   : > { %v2393_v35 = vpop.f32.mrb[20].mxu0  ;;  %v2415_v36 = vpop.f32.mrb[20].mxu1 }
 0x3d3   : > { %v2394_v37 = vpop.f32.mrb[21].mxu0  ;;  %v2416_v38 = vpop.f32.mrb[21].mxu1 }
 0x3d4   : > { %v2395_v39 = vadd.f32 %v2394_v37, %v2393_v35  ;;  %v2417_v40 = vadd.f32 %v2416_v38, %v2415_v36  ;;  %v2396_v41 = vpop.f32.mrb[22].mxu0  ;;  %v2418_v42 = vpop.f32.mrb[22].mxu1 }
 0x3d5   : > { %v2397_v43 = vpop.f32.mrb[23].mxu0  ;;  %v2419_v44 = vpop.f32.mrb[23].mxu1 }
 0x3d6   : > { %v1938_v45 = vadd.f32 %v2395_v39, %v1898_v33 }
 0x3d8   : > { %v1978_v46 = vadd.f32 %v2417_v40, %v1938_v45 }
 0x3da   : > { %v1996_v48 = vsel %vm3429_vm7, %v1978_v46, -1e+30  ;;  %v2017_v50 = vsel %vm3433_vm9, %v1978_v46, -1e+30  ;;  %v2294_v61 = vmul.f32 -1.442695, %v1978_v46 }
 0x3db   : > { %v1998_v49 = vsel %vm1997_vm8, %v1996_v48, -inf  ;;  %v2018_v51 = vsel %vm1997_vm8, %v2017_v50, -inf }
 0x3dc   : > { %1999 = vmax.xlane.f32.xlu0 %v1998_v49 }
 0x3e0   : > { %2019 = vmax.xlane.f32.xlu0 %v2018_v51 }
 0x469   : > { %v2000_v52 = vpop.xlane.xlu0 %1999 }
 0x46a   : > { %v2001_v53 = vsub.f32 %v1978_v46, %v2000_v52 }
 0x46c   : > { %v2002_v54 = vmul.f32 1.442695, %v2001_v53 }
 0x46d   : > { %v2020_v56 = vpop.xlane.xlu0 %2019 }
 0x46e   : > { %2661 = vpow2.f32 %v2002_v54  ;;  %v2021_v57 = vsub.f32 %v1978_v46, %v2020_v56 }
 0x470   : > { %v2022_v59 = vmul.f32 1.442695, %v2021_v57 }
 0x472   : > { %2663 = vpow2.f32 %v2022_v59 }
 0x473   : > { %2665 = vpow2.f32 %v2294_v61 }
 0x478   : > { %v2662_v60 = vpop.eup %2661 }
 0x479   : > { %v2004_v63 = vsel %vm3429_vm7, %v2662_v60, 0.0 }
 0x47a   : > { %v2005_v0 = vsel %vm1997_vm8, %v2004_v63, 0.0 }
 0x47b   : > { %2006 = vadd.xlane.f32.xlu1 %v2005_v0 }
 0x47c   : > { %v2664_v1 = vpop.eup %2663 }
 0x47d   : > { %v2024_v58 = vsel %vm3433_vm9, %v2664_v1, 0.0  ;;  %v2666_v3 = vpop.eup %2665 }
 0x47e   : > { %v2025_v55 = vsel %vm1997_vm8, %v2024_v58, 0.0  ;;  %v1989_v4 = vadd.f32 1.0, %v2666_v3 }
 0x47f   : > { %2026 = vadd.xlane.f32.xlu1 %v2025_v55 }
 0x508   : > { %v2007_v2 = vpop.xlane.xlu1 %2006 }
 0x509   : > { %2667 = vrcp.f32 %v2007_v2 }
 0x50c   : > { %v2027_v5 = vpop.xlane.xlu1 %2026 }
 0x50d   : > { %2669 = vrcp.f32 %v2027_v5 }
 0x50e   : > { %2671 = vrcp.f32 %v1989_v4 }
 0x513   : > { %v2668_v6 = vpop.eup %2667 }
 0x514   : > { %v2009_v7 = vmul.f32 %v2668_v6, %v2007_v2 }
 0x516   : > { %v2010_v8 = vsub.f32 2.0, %v2009_v7 }
 0x517   : > { %v2670_v9 = vpop.eup %2669 }
 0x518   : > { %v2011_v10 = vmul.f32 %v2668_v6, %v2010_v8  ;;  %v2029_v11 = vmul.f32 %v2670_v9, %v2027_v5  ;;  %v2672_v12 = vpop.eup %2671 }
 0x519   : > { %v1992_v16 = vsel %vm1985_vm10, %v2672_v12, 0.0 }
 0x51a   : > { %v2012_v13 = vmul.f32 %v2011_v10, %v2004_v63  ;;  %v2030_v14 = vsub.f32 2.0, %v2029_v11 }
 0x51c   : > { %v2031_v15 = vmul.f32 %v2670_v9, %v2030_v14  ;;  %v2013_v18 = vadd.f32 %v2012_v13, %v1992_v16 }
 0x51e   : > { %v2032_v17 = vmul.f32 %v2031_v15, %v2024_v58 }
 0x520   : > { %v2033_v19 = vadd.f32 %v2032_v17, %v2013_v18 }
 0x522   : > { %2034 = vst [vmem:[%s309_s26] sm:$0x1] %v2033_v19 }
 0x523   : > { %2686 = shalt.err (!%p2683_p5)
}
 0x524   : > { %s2687_s23 = scalar_lea.hbm %s3455_s19, 16  ;;  %s2691_s26 = scalar_lea.hbm %s3510_s8, 32 }
 0x525   : > { %p2688_p6 = scmp.ne.s32.totalorder %s3455_s19, %s2687_s23  ;;  %p2692_p10 = scmp.lt.u32.totalorder %s3455_s19, %s3510_s8 }
 0x526   : > { %p2693_p11 = scmp.lt.u32.totalorder %s2691_s26, %s2687_s23  ;;  %p2695_p13 = scmp.lt.u32.totalorder %s2687_s23, %s3455_s19 }
 0x527   : > { %p2689_p7 = pnand %p2688_p6, %p2843_p4 }
 0x528   : > { %p2694_p12 = por %p2693_p11, %p2692_p10 }
 0x529   : > { %p2690_p9 = pneg %p2689_p7 }
 0x52a   : > { %p2696_p0 = por %p2695_p13, %p2694_p12 }
 0x52c   : > { %p2697_p1 = pnand %p2696_p0, %p2690_p9 }
 0x52e   : > { %2700 = shalt.err (!%p2697_p1)
}
 0x52f   : > { %2523 = dma.vmem_to_hbm [thread:$0]  (%p2843_p4), %s3457_s11, 16, %s3455_s19, %s2036_s20  }
 0x530 PF: > { %p2529_p2 = scmp.ge.s32.totalorder %s2751_s10, 2  ;;  %s2060_s21 = sand.u32 1, %s2731_s27  }
 0x531   : > { %s2061_s30 = scalar_lea.sflag [#allocation4], %s2060_s21 }
 0x532   : > { %p2526_p3 = pnand %p2529_p2, %p2850_p8 }
 0x534   : > { %2726 = dma.done.wait (!%p2526_p3), %s2061_s30, 16  }
 0x535   : > { %2728 = vsyncadd (!%p2526_p3), %s2061_s30, 4294967280  ;;  %s21_s10 = sadd.s32 1, %s2751_s10   ;;  %s3517_s27 = smov %s2735_s28 }
 0x536   : > { %p18_p5 = scmp.ge.s32.totalorder %s21_s10, 4   ;;  %s3518_s28 = smov %s2739_s29 }
 0x537   : > { %s3519_s29 = smov %s2856_s18  ;;  %s3520_s30 = smov %s2747_s9 }
 0x538   : > { %s3521_s9 = smov %s3523_s13  ;;  %20 = sbr.rel (!%p18_p5) target bundleno = 4 (0x4), region = 100 }
 0x53f   :  { %2065 = vsyncpa [#allocation4], 1 }
 0x540   :  { %2067 = vsyncpa [#allocation4 + $0x1], 1 }

</bundles_post_ra>
